<compile_context>
chip_gen: v5e
topology: v5e:2x2
jax: 0.10.0
libtpu: 0.0.40
codegen_flags: <defaults>
</compile_context>

<pallas_src>
import functools

import jax
import jax.numpy as jnp
from jax.experimental import pallas as pl
from jax.experimental.pallas import tpu as pltpu


def _sigmoid(x):
    # sigmoid(x) == 0.5 * (tanh(x/2) + 1): a single EUP op on the serial chain.
    return 0.5 * (jnp.tanh(0.5 * x) + 1.0)


# ----------------------------------------------------------------------------
# Pallas kernel: full LSTM + FC forward in one invocation.
# ----------------------------------------------------------------------------
def _lstm_gen_kernel(x_ref,     # (T*B, L)      time-major flattened input
                     wih_ref,   # (L, 4H)       W_ih^T
                     whh_ref,   # (H, 4H)       W_hh^T
                     b_ref,     # (1, 4H)       b_ih + b_hh
                     wfc_ref,   # (H, Opad)     W_fc^T, zero-padded lanes
                     bfc_ref,   # (1, Opad)     fc bias, zero-padded lanes
                     out_ref,   # (T*B, Opad)   time-major flattened output
                     gx_ref,    # (T*B, 4H)     f32 scratch: input projection
                     h_ref,     # (B, H)        f32 scratch: hidden state
                     c_ref,     # (B, H)        f32 scratch: cell state
                     hs_ref,    # (T*B, H)      f32 scratch: all hidden states
                     *, seq_len, batch, hidden_dim):
    T, B, H = seq_len, batch, hidden_dim

    # ---- Prologue: input projection for ALL timesteps (off the serial path).
    gx_ref[...] = (jnp.dot(x_ref[...], wih_ref[...],
                           preferred_element_type=jnp.float32) + b_ref[...])

    # ---- t = 0 peeled: h0 == c0 == 0 -> no recurrent matmul, no forget gate.
    # PyTorch gate order: i, f, g, o (slices are 128-lane aligned for H=128).
    g0 = gx_ref[pl.ds(0, B), :]
    c_new = _sigmoid(g0[:, 0 * H:1 * H]) * jnp.tanh(g0[:, 2 * H:3 * H])
    h_new = _sigmoid(g0[:, 3 * H:4 * H]) * jnp.tanh(c_new)
    h_ref[...] = h_new
    c_ref[...] = c_new
    hs_ref[pl.ds(0, B), :] = h_new

    # ---- Serial recurrence for t = 1..T-1 (unrolled; T is small & static).
    # W_hh is read from VMEM inside each dot (no vreg hoist -> no spills).
    for t in range(1, T):
        row = t * B
        gates = gx_ref[pl.ds(row, B), :] + jnp.dot(
            h_ref[...], whh_ref[...], preferred_element_type=jnp.float32)
        i_g = _sigmoid(gates[:, 0 * H:1 * H])
        f_g = _sigmoid(gates[:, 1 * H:2 * H])
        g_g = jnp.tanh(gates[:, 2 * H:3 * H])
        o_g = _sigmoid(gates[:, 3 * H:4 * H])

        c_new = f_g * c_ref[...] + i_g * g_g
        h_new = o_g * jnp.tanh(c_new)

        h_ref[...] = h_new
        c_ref[...] = c_new
        hs_ref[pl.ds(row, B), :] = h_new

    # ---- Epilogue: one fused FC + tanh over all timesteps, dense 128-lane
    #      store (padding lanes are sliced away in the wrapper).
    y = jnp.tanh(jnp.dot(hs_ref[...], wfc_ref[...],
                         preferred_element_type=jnp.float32) + bfc_ref[...])
    out_ref[...] = y.astype(out_ref.dtype)


# ----------------------------------------------------------------------------
# Wrapper: parameter plumbing + pallas_call.
# ----------------------------------------------------------------------------
def lstm_generator_forward(z, params):
    """z: (B, T, latent_dim) float32 (PyTorch batch_first convention)."""
    w_ih, w_hh, b_ih, b_hh, w_fc, b_fc = (
        params["w_ih"], params["w_hh"], params["b_ih"],
        params["b_hh"], params["w_fc"], params["b_fc"])

    B, T, L = z.shape
    H = w_hh.shape[1]
    O = w_fc.shape[0]
    O_pad = ((O + 127) // 128) * 128          # lane-dense output slab width

    # Pre-transpose / pad weights once in plain JAX (glue, not hot path).
    wih_t = jnp.transpose(w_ih)                                   # (L, 4H)
    whh_t = jnp.transpose(w_hh)                                   # (H, 4H)
    b = (b_ih + b_hh).reshape(1, 4 * H)                           # (1, 4H)
    wfc_t = jnp.zeros((H, O_pad), z.dtype).at[:, :O].set(jnp.transpose(w_fc))
    bfc = jnp.zeros((1, O_pad), z.dtype).at[:, :O].set(b_fc.reshape(1, O))

    # Time-major, flattened so row t*B + b is (timestep t, batch b).
    x_flat = jnp.transpose(z, (1, 0, 2)).reshape(T * B, L)

    kernel = functools.partial(_lstm_gen_kernel,
                               seq_len=T, batch=B, hidden_dim=H)

    out_flat = pl.pallas_call(
        kernel,
        out_shape=jax.ShapeDtypeStruct((T * B, O_pad), z.dtype),
        grid=(1,),                                            # single invocation
        in_specs=[
            pl.BlockSpec((T * B, L), lambda i: (0, 0)),       # x (all steps)
            pl.BlockSpec((L, 4 * H), lambda i: (0, 0)),       # W_ih^T
            pl.BlockSpec((H, 4 * H), lambda i: (0, 0)),       # W_hh^T
            pl.BlockSpec((1, 4 * H), lambda i: (0, 0)),       # bias
            pl.BlockSpec((H, O_pad), lambda i: (0, 0)),       # W_fc^T (padded)
            pl.BlockSpec((1, O_pad), lambda i: (0, 0)),       # fc bias (padded)
        ],
        out_specs=pl.BlockSpec((T * B, O_pad), lambda i: (0, 0)),
        scratch_shapes=[
            pltpu.VMEM((T * B, 4 * H), jnp.float32),          # gates_x
            pltpu.VMEM((B, H), jnp.float32),                  # h state
            pltpu.VMEM((B, H), jnp.float32),                  # c state
            pltpu.VMEM((T * B, H), jnp.float32),              # all h_t
        ],
    )(x_flat, wih_t, whh_t, b, wfc_t, bfc)

    # (T*B, Opad) -> strip lane padding -> (T, B, O) -> (B, T, O)
    return jnp.transpose(out_flat[:, :O].reshape(T, B, O), (1, 0, 2))


# ----------------------------------------------------------------------------
# Pure-JAX reference (mirrors torch.nn.LSTM + Linear + tanh semantics).
# ----------------------------------------------------------------------------
def lstm_generator_reference(z, params):
    w_ih, w_hh, b_ih, b_hh, w_fc, b_fc = (
        params["w_ih"], params["w_hh"], params["b_ih"],
        params["b_hh"], params["w_fc"], params["b_fc"])
    B, T, L = z.shape
    H = w_hh.shape[1]

    def step(carry, x_t):
        h, c = carry
        gates = x_t @ w_ih.T + b_ih + h @ w_hh.T + b_hh
        i, f, g, o = jnp.split(gates, 4, axis=-1)
        i = jax.nn.sigmoid(i)
        f = jax.nn.sigmoid(f)
        g = jnp.tanh(g)
        o = jax.nn.sigmoid(o)
        c = f * c + i * g
        h = o * jnp.tanh(c)
        return (h, c), h

    h0 = jnp.zeros((B, H), jnp.float32)
    c0 = jnp.zeros((B, H), jnp.float32)
    _, hs = jax.lax.scan(step, (h0, c0), jnp.transpose(z, (1, 0, 2)))
    out = jnp.tanh(jnp.einsum("tbh,oh->tbo", hs, w_fc) + b_fc)
    return jnp.transpose(out, (1, 0, 2))


# ----------------------------------------------------------------------------
# Deterministic parameter init (PyTorch-style uniform(-1/sqrt(H), 1/sqrt(H))).
# ----------------------------------------------------------------------------
def init_params(key, latent_dim, output_dim, hidden_dim):
    ks = jax.random.split(key, 6)
    bound = 1.0 / jnp.sqrt(hidden_dim)
    u = lambda k, shape: jax.random.uniform(k, shape, jnp.float32, -bound, bound)
    return {
        "w_ih": u(ks[0], (4 * hidden_dim, latent_dim)),
        "w_hh": u(ks[1], (4 * hidden_dim, hidden_dim)),
        "b_ih": u(ks[2], (4 * hidden_dim,)),
        "b_hh": u(ks[3], (4 * hidden_dim,)),
        "w_fc": u(ks[4], (output_dim, hidden_dim)),
        "b_fc": u(ks[5], (output_dim,)),
    }


if __name__ == "__main__":
    latent_dim, output_dim, hidden_dim = 16, 16, 128
    batch, seq = 8, 8

    key = jax.random.PRNGKey(0)
    k_z, k_p = jax.random.split(key)
    z = jax.random.normal(k_z, (batch, seq, latent_dim), jnp.float32)
    params = init_params(k_p, latent_dim, output_dim, hidden_dim)

    out = jax.block_until_ready(lstm_generator_forward(z, params))
    ref = jax.block_until_ready(lstm_generator_reference(z, params))

    assert out.shape == (batch, seq, output_dim)
    assert jnp.allclose(out, ref, rtol=1e-4, atol=1e-4), \
        f"max abs err {jnp.max(jnp.abs(out - ref))}"
    print("KERNEL_OK")
</pallas_src>

<mosaic_0001>
module attributes {stable_mosaic.version = 11 : i64} {
  func.func @_lstm_gen_kernel(%arg0: i32, %arg1: memref<64x16xf32, #tpu.memory_space<vmem>>, %arg2: memref<16x512xf32, #tpu.memory_space<vmem>>, %arg3: memref<128x512xf32, #tpu.memory_space<vmem>>, %arg4: memref<1x512xf32, #tpu.memory_space<vmem>>, %arg5: memref<128x128xf32, #tpu.memory_space<vmem>>, %arg6: memref<1x128xf32, #tpu.memory_space<vmem>>, %arg7: memref<64x128xf32, #tpu.memory_space<vmem>>, %arg8: memref<64x512xf32, #tpu.memory_space<vmem>>, %arg9: memref<8x128xf32, #tpu.memory_space<vmem>>, %arg10: memref<8x128xf32, #tpu.memory_space<vmem>>, %arg11: memref<64x128xf32, #tpu.memory_space<vmem>>) attributes {dimension_semantics = [#tpu.dimension_semantics<arbitrary>], iteration_bounds = array<i64: 1>, scalar_prefetch = 0 : i64, scratch_operands = 4 : i64, tpu.core_type = #tpu.core_type<tc>, window_params = [{pipeline_mode = #tpu.pipeline_mode<synchronous>, transform_indices = @transform_0, window_bounds = array<i64: 64, 16>}, {pipeline_mode = #tpu.pipeline_mode<synchronous>, transform_indices = @transform_1, window_bounds = array<i64: 16, 512>}, {pipeline_mode = #tpu.pipeline_mode<synchronous>, transform_indices = @transform_2, window_bounds = array<i64: 128, 512>}, {pipeline_mode = #tpu.pipeline_mode<synchronous>, transform_indices = @transform_3, window_bounds = array<i64: 1, 512>}, {pipeline_mode = #tpu.pipeline_mode<synchronous>, transform_indices = @transform_4, window_bounds = array<i64: 128, 128>}, {pipeline_mode = #tpu.pipeline_mode<synchronous>, transform_indices = @transform_5, window_bounds = array<i64: 1, 128>}, {pipeline_mode = #tpu.pipeline_mode<synchronous>, transform_indices = @transform_6, window_bounds = array<i64: 64, 128>}]} {
    %c0 = arith.constant 0 : index
    %c0_0 = arith.constant 0 : index
    %0 = vector.load %arg1[%c0, %c0_0] : memref<64x16xf32, #tpu.memory_space<vmem>>, vector<64x16xf32>
    %c0_1 = arith.constant 0 : index
    %c0_2 = arith.constant 0 : index
    %1 = vector.load %arg2[%c0_1, %c0_2] : memref<16x512xf32, #tpu.memory_space<vmem>>, vector<16x512xf32>
    %cst = arith.constant dense<0.000000e+00> : vector<64x512xf32>
    %2 = tpu.matmul %0, %1, %cst {dimension_numbers = #tpu.dot_dimension_numbers<[1], [0], [0], [1], [0, 0, 1, 1], [], []>} : vector<64x16xf32>, vector<16x512xf32>, vector<64x512xf32> -> vector<64x512xf32>
    %c0_3 = arith.constant 0 : index
    %c0_4 = arith.constant 0 : index
    %3 = vector.load %arg4[%c0_3, %c0_4] : memref<1x512xf32, #tpu.memory_space<vmem>>, vector<1x512xf32>
    %4 = vector.broadcast %3 : vector<1x512xf32> to vector<64x512xf32>
    %5 = arith.addf %2, %4 : vector<64x512xf32>
    %c0_5 = arith.constant 0 : index
    %c0_6 = arith.constant 0 : index
    %6 = vector.load %arg8[%c0_5, %c0_6] : memref<64x512xf32, #tpu.memory_space<vmem>>, vector<64x512xf32>
    tpu.vector_store %arg8[%c0_5, %c0_6], %5 {strides = array<i32>} : memref<64x512xf32, #tpu.memory_space<vmem>>, vector<64x512xf32>,
    %c0_7 = arith.constant 0 : index
    %c0_8 = arith.constant 0 : index
    %7 = vector.load %arg8[%c0_7, %c0_8] : memref<64x512xf32, #tpu.memory_space<vmem>>, vector<8x512xf32>
    %8 = vector.extract_strided_slice %7 {offsets = [0, 0], sizes = [8, 128], strides = [1, 1]} : vector<8x512xf32> to vector<8x128xf32>
    %cst_9 = arith.constant 5.000000e-01 : f32
    %9 = vector.broadcast %cst_9 : f32 to vector<8x128xf32>
    %10 = arith.mulf %9, %8 : vector<8x128xf32>
    %11 = math.tanh %10 : vector<8x128xf32>
    %cst_10 = arith.constant 1.000000e+00 : f32
    %12 = vector.broadcast %cst_10 : f32 to vector<8x128xf32>
    %13 = arith.addf %11, %12 : vector<8x128xf32>
    %cst_11 = arith.constant 5.000000e-01 : f32
    %14 = vector.broadcast %cst_11 : f32 to vector<8x128xf32>
    %15 = arith.mulf %14, %13 : vector<8x128xf32>
    %16 = vector.extract_strided_slice %7 {offsets = [0, 256], sizes = [8, 128], strides = [1, 1]} : vector<8x512xf32> to vector<8x128xf32>
    %17 = math.tanh %16 : vector<8x128xf32>
    %18 = arith.mulf %15, %17 : vector<8x128xf32>
    %19 = vector.extract_strided_slice %7 {offsets = [0, 384], sizes = [8, 128], strides = [1, 1]} : vector<8x512xf32> to vector<8x128xf32>
    %cst_12 = arith.constant 5.000000e-01 : f32
    %20 = vector.broadcast %cst_12 : f32 to vector<8x128xf32>
    %21 = arith.mulf %20, %19 : vector<8x128xf32>
    %22 = math.tanh %21 : vector<8x128xf32>
    %cst_13 = arith.constant 1.000000e+00 : f32
    %23 = vector.broadcast %cst_13 : f32 to vector<8x128xf32>
    %24 = arith.addf %22, %23 : vector<8x128xf32>
    %cst_14 = arith.constant 5.000000e-01 : f32
    %25 = vector.broadcast %cst_14 : f32 to vector<8x128xf32>
    %26 = arith.mulf %25, %24 : vector<8x128xf32>
    %27 = math.tanh %18 : vector<8x128xf32>
    %28 = arith.mulf %26, %27 : vector<8x128xf32>
    %c0_15 = arith.constant 0 : index
    %c0_16 = arith.constant 0 : index
    %29 = vector.load %arg9[%c0_15, %c0_16] : memref<8x128xf32, #tpu.memory_space<vmem>>, vector<8x128xf32>
    tpu.vector_store %arg9[%c0_15, %c0_16], %28 {strides = array<i32>} : memref<8x128xf32, #tpu.memory_space<vmem>>, vector<8x128xf32>,
    %c0_17 = arith.constant 0 : index
    %c0_18 = arith.constant 0 : index
    %30 = vector.load %arg10[%c0_17, %c0_18] : memref<8x128xf32, #tpu.memory_space<vmem>>, vector<8x128xf32>
    tpu.vector_store %arg10[%c0_17, %c0_18], %18 {strides = array<i32>} : memref<8x128xf32, #tpu.memory_space<vmem>>, vector<8x128xf32>,
    %c0_19 = arith.constant 0 : index
    %c0_20 = arith.constant 0 : index
    %31 = vector.load %arg11[%c0_19, %c0_20] : memref<64x128xf32, #tpu.memory_space<vmem>>, vector<8x128xf32>
    tpu.vector_store %arg11[%c0_19, %c0_20], %28 {strides = array<i32>} : memref<64x128xf32, #tpu.memory_space<vmem>>, vector<8x128xf32>,
    %c8 = arith.constant 8 : index
    %c0_21 = arith.constant 0 : index
    %32 = vector.load %arg8[%c8, %c0_21] : memref<64x512xf32, #tpu.memory_space<vmem>>, vector<8x512xf32>
    %c0_22 = arith.constant 0 : index
    %c0_23 = arith.constant 0 : index
    %33 = vector.load %arg9[%c0_22, %c0_23] : memref<8x128xf32, #tpu.memory_space<vmem>>, vector<8x128xf32>
    %c0_24 = arith.constant 0 : index
    %c0_25 = arith.constant 0 : index
    %34 = vector.load %arg3[%c0_24, %c0_25] : memref<128x512xf32, #tpu.memory_space<vmem>>, vector<128x512xf32>
    %cst_26 = arith.constant dense<0.000000e+00> : vector<8x512xf32>
    %35 = tpu.matmul %33, %34, %cst_26 {dimension_numbers = #tpu.dot_dimension_numbers<[1], [0], [0], [1], [0, 0, 1, 1], [], []>} : vector<8x128xf32>, vector<128x512xf32>, vector<8x512xf32> -> vector<8x512xf32>
    %36 = arith.addf %32, %35 : vector<8x512xf32>
    %37 = vector.extract_strided_slice %36 {offsets = [0, 0], sizes = [8, 128], strides = [1, 1]} : vector<8x512xf32> to vector<8x128xf32>
    %cst_27 = arith.constant 5.000000e-01 : f32
    %38 = vector.broadcast %cst_27 : f32 to vector<8x128xf32>
    %39 = arith.mulf %38, %37 : vector<8x128xf32>
    %40 = math.tanh %39 : vector<8x128xf32>
    %cst_28 = arith.constant 1.000000e+00 : f32
    %41 = vector.broadcast %cst_28 : f32 to vector<8x128xf32>
    %42 = arith.addf %40, %41 : vector<8x128xf32>
    %cst_29 = arith.constant 5.000000e-01 : f32
    %43 = vector.broadcast %cst_29 : f32 to vector<8x128xf32>
    %44 = arith.mulf %43, %42 : vector<8x128xf32>
    %45 = vector.extract_strided_slice %36 {offsets = [0, 128], sizes = [8, 128], strides = [1, 1]} : vector<8x512xf32> to vector<8x128xf32>
    %cst_30 = arith.constant 5.000000e-01 : f32
    %46 = vector.broadcast %cst_30 : f32 to vector<8x128xf32>
    %47 = arith.mulf %46, %45 : vector<8x128xf32>
    %48 = math.tanh %47 : vector<8x128xf32>
    %cst_31 = arith.constant 1.000000e+00 : f32
    %49 = vector.broadcast %cst_31 : f32 to vector<8x128xf32>
    %50 = arith.addf %48, %49 : vector<8x128xf32>
    %cst_32 = arith.constant 5.000000e-01 : f32
    %51 = vector.broadcast %cst_32 : f32 to vector<8x128xf32>
    %52 = arith.mulf %51, %50 : vector<8x128xf32>
    %53 = vector.extract_strided_slice %36 {offsets = [0, 256], sizes = [8, 128], strides = [1, 1]} : vector<8x512xf32> to vector<8x128xf32>
    %54 = math.tanh %53 : vector<8x128xf32>
    %55 = vector.extract_strided_slice %36 {offsets = [0, 384], sizes = [8, 128], strides = [1, 1]} : vector<8x512xf32> to vector<8x128xf32>
    %cst_33 = arith.constant 5.000000e-01 : f32
    %56 = vector.broadcast %cst_33 : f32 to vector<8x128xf32>
    %57 = arith.mulf %56, %55 : vector<8x128xf32>
    %58 = math.tanh %57 : vector<8x128xf32>
    %cst_34 = arith.constant 1.000000e+00 : f32
    %59 = vector.broadcast %cst_34 : f32 to vector<8x128xf32>
    %60 = arith.addf %58, %59 : vector<8x128xf32>
    %cst_35 = arith.constant 5.000000e-01 : f32
    %61 = vector.broadcast %cst_35 : f32 to vector<8x128xf32>
    %62 = arith.mulf %61, %60 : vector<8x128xf32>
    %c0_36 = arith.constant 0 : index
    %c0_37 = arith.constant 0 : index
    %63 = vector.load %arg10[%c0_36, %c0_37] : memref<8x128xf32, #tpu.memory_space<vmem>>, vector<8x128xf32>
    %64 = arith.mulf %52, %63 : vector<8x128xf32>
    %65 = arith.mulf %44, %54 : vector<8x128xf32>
    %66 = arith.addf %64, %65 : vector<8x128xf32>
    %67 = math.tanh %66 : vector<8x128xf32>
    %68 = arith.mulf %62, %67 : vector<8x128xf32>
    %c0_38 = arith.constant 0 : index
    %c0_39 = arith.constant 0 : index
    %69 = vector.load %arg9[%c0_38, %c0_39] : memref<8x128xf32, #tpu.memory_space<vmem>>, vector<8x128xf32>
    tpu.vector_store %arg9[%c0_38, %c0_39], %68 {strides = array<i32>} : memref<8x128xf32, #tpu.memory_space<vmem>>, vector<8x128xf32>,
    %c0_40 = arith.constant 0 : index
    %c0_41 = arith.constant 0 : index
    %70 = vector.load %arg10[%c0_40, %c0_41] : memref<8x128xf32, #tpu.memory_space<vmem>>, vector<8x128xf32>
    tpu.vector_store %arg10[%c0_40, %c0_41], %66 {strides = array<i32>} : memref<8x128xf32, #tpu.memory_space<vmem>>, vector<8x128xf32>,
    %c8_42 = arith.constant 8 : index
    %c0_43 = arith.constant 0 : index
    %71 = vector.load %arg11[%c8_42, %c0_43] : memref<64x128xf32, #tpu.memory_space<vmem>>, vector<8x128xf32>
    tpu.vector_store %arg11[%c8_42, %c0_43], %68 {strides = array<i32>} : memref<64x128xf32, #tpu.memory_space<vmem>>, vector<8x128xf32>,
    %c16 = arith.constant 16 : index
    %c0_44 = arith.constant 0 : index
    %72 = vector.load %arg8[%c16, %c0_44] : memref<64x512xf32, #tpu.memory_space<vmem>>, vector<8x512xf32>
    %c0_45 = arith.constant 0 : index
    %c0_46 = arith.constant 0 : index
    %73 = vector.load %arg9[%c0_45, %c0_46] : memref<8x128xf32, #tpu.memory_space<vmem>>, vector<8x128xf32>
    %c0_47 = arith.constant 0 : index
    %c0_48 = arith.constant 0 : index
    %74 = vector.load %arg3[%c0_47, %c0_48] : memref<128x512xf32, #tpu.memory_space<vmem>>, vector<128x512xf32>
    %cst_49 = arith.constant dense<0.000000e+00> : vector<8x512xf32>
    %75 = tpu.matmul %73, %74, %cst_49 {dimension_numbers = #tpu.dot_dimension_numbers<[1], [0], [0], [1], [0, 0, 1, 1], [], []>} : vector<8x128xf32>, vector<128x512xf32>, vector<8x512xf32> -> vector<8x512xf32>
    %76 = arith.addf %72, %75 : vector<8x512xf32>
    %77 = vector.extract_strided_slice %76 {offsets = [0, 0], sizes = [8, 128], strides = [1, 1]} : vector<8x512xf32> to vector<8x128xf32>
    %cst_50 = arith.constant 5.000000e-01 : f32
    %78 = vector.broadcast %cst_50 : f32 to vector<8x128xf32>
    %79 = arith.mulf %78, %77 : vector<8x128xf32>
    %80 = math.tanh %79 : vector<8x128xf32>
    %cst_51 = arith.constant 1.000000e+00 : f32
    %81 = vector.broadcast %cst_51 : f32 to vector<8x128xf32>
    %82 = arith.addf %80, %81 : vector<8x128xf32>
    %cst_52 = arith.constant 5.000000e-01 : f32
    %83 = vector.broadcast %cst_52 : f32 to vector<8x128xf32>
    %84 = arith.mulf %83, %82 : vector<8x128xf32>
    %85 = vector.extract_strided_slice %76 {offsets = [0, 128], sizes = [8, 128], strides = [1, 1]} : vector<8x512xf32> to vector<8x128xf32>
    %cst_53 = arith.constant 5.000000e-01 : f32
    %86 = vector.broadcast %cst_53 : f32 to vector<8x128xf32>
    %87 = arith.mulf %86, %85 : vector<8x128xf32>
    %88 = math.tanh %87 : vector<8x128xf32>
    %cst_54 = arith.constant 1.000000e+00 : f32
    %89 = vector.broadcast %cst_54 : f32 to vector<8x128xf32>
    %90 = arith.addf %88, %89 : vector<8x128xf32>
    %cst_55 = arith.constant 5.000000e-01 : f32
    %91 = vector.broadcast %cst_55 : f32 to vector<8x128xf32>
    %92 = arith.mulf %91, %90 : vector<8x128xf32>
    %93 = vector.extract_strided_slice %76 {offsets = [0, 256], sizes = [8, 128], strides = [1, 1]} : vector<8x512xf32> to vector<8x128xf32>
    %94 = math.tanh %93 : vector<8x128xf32>
    %95 = vector.extract_strided_slice %76 {offsets = [0, 384], sizes = [8, 128], strides = [1, 1]} : vector<8x512xf32> to vector<8x128xf32>
    %cst_56 = arith.constant 5.000000e-01 : f32
    %96 = vector.broadcast %cst_56 : f32 to vector<8x128xf32>
    %97 = arith.mulf %96, %95 : vector<8x128xf32>
    %98 = math.tanh %97 : vector<8x128xf32>
    %cst_57 = arith.constant 1.000000e+00 : f32
    %99 = vector.broadcast %cst_57 : f32 to vector<8x128xf32>
    %100 = arith.addf %98, %99 : vector<8x128xf32>
    %cst_58 = arith.constant 5.000000e-01 : f32
    %101 = vector.broadcast %cst_58 : f32 to vector<8x128xf32>
    %102 = arith.mulf %101, %100 : vector<8x128xf32>
    %c0_59 = arith.constant 0 : index
    %c0_60 = arith.constant 0 : index
    %103 = vector.load %arg10[%c0_59, %c0_60] : memref<8x128xf32, #tpu.memory_space<vmem>>, vector<8x128xf32>
    %104 = arith.mulf %92, %103 : vector<8x128xf32>
    %105 = arith.mulf %84, %94 : vector<8x128xf32>
    %106 = arith.addf %104, %105 : vector<8x128xf32>
    %107 = math.tanh %106 : vector<8x128xf32>
    %108 = arith.mulf %102, %107 : vector<8x128xf32>
    %c0_61 = arith.constant 0 : index
    %c0_62 = arith.constant 0 : index
    %109 = vector.load %arg9[%c0_61, %c0_62] : memref<8x128xf32, #tpu.memory_space<vmem>>, vector<8x128xf32>
    tpu.vector_store %arg9[%c0_61, %c0_62], %108 {strides = array<i32>} : memref<8x128xf32, #tpu.memory_space<vmem>>, vector<8x128xf32>,
    %c0_63 = arith.constant 0 : index
    %c0_64 = arith.constant 0 : index
    %110 = vector.load %arg10[%c0_63, %c0_64] : memref<8x128xf32, #tpu.memory_space<vmem>>, vector<8x128xf32>
    tpu.vector_store %arg10[%c0_63, %c0_64], %106 {strides = array<i32>} : memref<8x128xf32, #tpu.memory_space<vmem>>, vector<8x128xf32>,
    %c16_65 = arith.constant 16 : index
    %c0_66 = arith.constant 0 : index
    %111 = vector.load %arg11[%c16_65, %c0_66] : memref<64x128xf32, #tpu.memory_space<vmem>>, vector<8x128xf32>
    tpu.vector_store %arg11[%c16_65, %c0_66], %108 {strides = array<i32>} : memref<64x128xf32, #tpu.memory_space<vmem>>, vector<8x128xf32>,
    %c24 = arith.constant 24 : index
    %c0_67 = arith.constant 0 : index
    %112 = vector.load %arg8[%c24, %c0_67] : memref<64x512xf32, #tpu.memory_space<vmem>>, vector<8x512xf32>
    %c0_68 = arith.constant 0 : index
    %c0_69 = arith.constant 0 : index
    %113 = vector.load %arg9[%c0_68, %c0_69] : memref<8x128xf32, #tpu.memory_space<vmem>>, vector<8x128xf32>
    %c0_70 = arith.constant 0 : index
    %c0_71 = arith.constant 0 : index
    %114 = vector.load %arg3[%c0_70, %c0_71] : memref<128x512xf32, #tpu.memory_space<vmem>>, vector<128x512xf32>
    %cst_72 = arith.constant dense<0.000000e+00> : vector<8x512xf32>
    %115 = tpu.matmul %113, %114, %cst_72 {dimension_numbers = #tpu.dot_dimension_numbers<[1], [0], [0], [1], [0, 0, 1, 1], [], []>} : vector<8x128xf32>, vector<128x512xf32>, vector<8x512xf32> -> vector<8x512xf32>
    %116 = arith.addf %112, %115 : vector<8x512xf32>
    %117 = vector.extract_strided_slice %116 {offsets = [0, 0], sizes = [8, 128], strides = [1, 1]} : vector<8x512xf32> to vector<8x128xf32>
    %cst_73 = arith.constant 5.000000e-01 : f32
    %118 = vector.broadcast %cst_73 : f32 to vector<8x128xf32>
    %119 = arith.mulf %118, %117 : vector<8x128xf32>
    %120 = math.tanh %119 : vector<8x128xf32>
    %cst_74 = arith.constant 1.000000e+00 : f32
    %121 = vector.broadcast %cst_74 : f32 to vector<8x128xf32>
    %122 = arith.addf %120, %121 : vector<8x128xf32>
    %cst_75 = arith.constant 5.000000e-01 : f32
    %123 = vector.broadcast %cst_75 : f32 to vector<8x128xf32>
    %124 = arith.mulf %123, %122 : vector<8x128xf32>
    %125 = vector.extract_strided_slice %116 {offsets = [0, 128], sizes = [8, 128], strides = [1, 1]} : vector<8x512xf32> to vector<8x128xf32>
    %cst_76 = arith.constant 5.000000e-01 : f32
    %126 = vector.broadcast %cst_76 : f32 to vector<8x128xf32>
    %127 = arith.mulf %126, %125 : vector<8x128xf32>
    %128 = math.tanh %127 : vector<8x128xf32>
    %cst_77 = arith.constant 1.000000e+00 : f32
    %129 = vector.broadcast %cst_77 : f32 to vector<8x128xf32>
    %130 = arith.addf %128, %129 : vector<8x128xf32>
    %cst_78 = arith.constant 5.000000e-01 : f32
    %131 = vector.broadcast %cst_78 : f32 to vector<8x128xf32>
    %132 = arith.mulf %131, %130 : vector<8x128xf32>
    %133 = vector.extract_strided_slice %116 {offsets = [0, 256], sizes = [8, 128], strides = [1, 1]} : vector<8x512xf32> to vector<8x128xf32>
    %134 = math.tanh %133 : vector<8x128xf32>
    %135 = vector.extract_strided_slice %116 {offsets = [0, 384], sizes = [8, 128], strides = [1, 1]} : vector<8x512xf32> to vector<8x128xf32>
    %cst_79 = arith.constant 5.000000e-01 : f32
    %136 = vector.broadcast %cst_79 : f32 to vector<8x128xf32>
    %137 = arith.mulf %136, %135 : vector<8x128xf32>
    %138 = math.tanh %137 : vector<8x128xf32>
    %cst_80 = arith.constant 1.000000e+00 : f32
    %139 = vector.broadcast %cst_80 : f32 to vector<8x128xf32>
    %140 = arith.addf %138, %139 : vector<8x128xf32>
    %cst_81 = arith.constant 5.000000e-01 : f32
    %141 = vector.broadcast %cst_81 : f32 to vector<8x128xf32>
    %142 = arith.mulf %141, %140 : vector<8x128xf32>
    %c0_82 = arith.constant 0 : index
    %c0_83 = arith.constant 0 : index
    %143 = vector.load %arg10[%c0_82, %c0_83] : memref<8x128xf32, #tpu.memory_space<vmem>>, vector<8x128xf32>
    %144 = arith.mulf %132, %143 : vector<8x128xf32>
    %145 = arith.mulf %124, %134 : vector<8x128xf32>
    %146 = arith.addf %144, %145 : vector<8x128xf32>
    %147 = math.tanh %146 : vector<8x128xf32>
    %148 = arith.mulf %142, %147 : vector<8x128xf32>
    %c0_84 = arith.constant 0 : index
    %c0_85 = arith.constant 0 : index
    %149 = vector.load %arg9[%c0_84, %c0_85] : memref<8x128xf32, #tpu.memory_space<vmem>>, vector<8x128xf32>
    tpu.vector_store %arg9[%c0_84, %c0_85], %148 {strides = array<i32>} : memref<8x128xf32, #tpu.memory_space<vmem>>, vector<8x128xf32>,
    %c0_86 = arith.constant 0 : index
    %c0_87 = arith.constant 0 : index
    %150 = vector.load %arg10[%c0_86, %c0_87] : memref<8x128xf32, #tpu.memory_space<vmem>>, vector<8x128xf32>
    tpu.vector_store %arg10[%c0_86, %c0_87], %146 {strides = array<i32>} : memref<8x128xf32, #tpu.memory_space<vmem>>, vector<8x128xf32>,
    %c24_88 = arith.constant 24 : index
    %c0_89 = arith.constant 0 : index
    %151 = vector.load %arg11[%c24_88, %c0_89] : memref<64x128xf32, #tpu.memory_space<vmem>>, vector<8x128xf32>
    tpu.vector_store %arg11[%c24_88, %c0_89], %148 {strides = array<i32>} : memref<64x128xf32, #tpu.memory_space<vmem>>, vector<8x128xf32>,
    %c32 = arith.constant 32 : index
    %c0_90 = arith.constant 0 : index
    %152 = vector.load %arg8[%c32, %c0_90] : memref<64x512xf32, #tpu.memory_space<vmem>>, vector<8x512xf32>
    %c0_91 = arith.constant 0 : index
    %c0_92 = arith.constant 0 : index
    %153 = vector.load %arg9[%c0_91, %c0_92] : memref<8x128xf32, #tpu.memory_space<vmem>>, vector<8x128xf32>
    %c0_93 = arith.constant 0 : index
    %c0_94 = arith.constant 0 : index
    %154 = vector.load %arg3[%c0_93, %c0_94] : memref<128x512xf32, #tpu.memory_space<vmem>>, vector<128x512xf32>
    %cst_95 = arith.constant dense<0.000000e+00> : vector<8x512xf32>
    %155 = tpu.matmul %153, %154, %cst_95 {dimension_numbers = #tpu.dot_dimension_numbers<[1], [0], [0], [1], [0, 0, 1, 1], [], []>} : vector<8x128xf32>, vector<128x512xf32>, vector<8x512xf32> -> vector<8x512xf32>
    %156 = arith.addf %152, %155 : vector<8x512xf32>
    %157 = vector.extract_strided_slice %156 {offsets = [0, 0], sizes = [8, 128], strides = [1, 1]} : vector<8x512xf32> to vector<8x128xf32>
    %cst_96 = arith.constant 5.000000e-01 : f32
    %158 = vector.broadcast %cst_96 : f32 to vector<8x128xf32>
    %159 = arith.mulf %158, %157 : vector<8x128xf32>
    %160 = math.tanh %159 : vector<8x128xf32>
    %cst_97 = arith.constant 1.000000e+00 : f32
    %161 = vector.broadcast %cst_97 : f32 to vector<8x128xf32>
    %162 = arith.addf %160, %161 : vector<8x128xf32>
    %cst_98 = arith.constant 5.000000e-01 : f32
    %163 = vector.broadcast %cst_98 : f32 to vector<8x128xf32>
    %164 = arith.mulf %163, %162 : vector<8x128xf32>
    %165 = vector.extract_strided_slice %156 {offsets = [0, 128], sizes = [8, 128], strides = [1, 1]} : vector<8x512xf32> to vector<8x128xf32>
    %cst_99 = arith.constant 5.000000e-01 : f32
    %166 = vector.broadcast %cst_99 : f32 to vector<8x128xf32>
    %167 = arith.mulf %166, %165 : vector<8x128xf32>
    %168 = math.tanh %167 : vector<8x128xf32>
    %cst_100 = arith.constant 1.000000e+00 : f32
    %169 = vector.broadcast %cst_100 : f32 to vector<8x128xf32>
    %170 = arith.addf %168, %169 : vector<8x128xf32>
    %cst_101 = arith.constant 5.000000e-01 : f32
    %171 = vector.broadcast %cst_101 : f32 to vector<8x128xf32>
    %172 = arith.mulf %171, %170 : vector<8x128xf32>
    %173 = vector.extract_strided_slice %156 {offsets = [0, 256], sizes = [8, 128], strides = [1, 1]} : vector<8x512xf32> to vector<8x128xf32>
    %174 = math.tanh %173 : vector<8x128xf32>
    %175 = vector.extract_strided_slice %156 {offsets = [0, 384], sizes = [8, 128], strides = [1, 1]} : vector<8x512xf32> to vector<8x128xf32>
    %cst_102 = arith.constant 5.000000e-01 : f32
    %176 = vector.broadcast %cst_102 : f32 to vector<8x128xf32>
    %177 = arith.mulf %176, %175 : vector<8x128xf32>
    %178 = math.tanh %177 : vector<8x128xf32>
    %cst_103 = arith.constant 1.000000e+00 : f32
    %179 = vector.broadcast %cst_103 : f32 to vector<8x128xf32>
    %180 = arith.addf %178, %179 : vector<8x128xf32>
    %cst_104 = arith.constant 5.000000e-01 : f32
    %181 = vector.broadcast %cst_104 : f32 to vector<8x128xf32>
    %182 = arith.mulf %181, %180 : vector<8x128xf32>
    %c0_105 = arith.constant 0 : index
    %c0_106 = arith.constant 0 : index
    %183 = vector.load %arg10[%c0_105, %c0_106] : memref<8x128xf32, #tpu.memory_space<vmem>>, vector<8x128xf32>
    %184 = arith.mulf %172, %183 : vector<8x128xf32>
    %185 = arith.mulf %164, %174 : vector<8x128xf32>
    %186 = arith.addf %184, %185 : vector<8x128xf32>
    %187 = math.tanh %186 : vector<8x128xf32>
    %188 = arith.mulf %182, %187 : vector<8x128xf32>
    %c0_107 = arith.constant 0 : index
    %c0_108 = arith.constant 0 : index
    %189 = vector.load %arg9[%c0_107, %c0_108] : memref<8x128xf32, #tpu.memory_space<vmem>>, vector<8x128xf32>
    tpu.vector_store %arg9[%c0_107, %c0_108], %188 {strides = array<i32>} : memref<8x128xf32, #tpu.memory_space<vmem>>, vector<8x128xf32>,
    %c0_109 = arith.constant 0 : index
    %c0_110 = arith.constant 0 : index
    %190 = vector.load %arg10[%c0_109, %c0_110] : memref<8x128xf32, #tpu.memory_space<vmem>>, vector<8x128xf32>
    tpu.vector_store %arg10[%c0_109, %c0_110], %186 {strides = array<i32>} : memref<8x128xf32, #tpu.memory_space<vmem>>, vector<8x128xf32>,
    %c32_111 = arith.constant 32 : index
    %c0_112 = arith.constant 0 : index
    %191 = vector.load %arg11[%c32_111, %c0_112] : memref<64x128xf32, #tpu.memory_space<vmem>>, vector<8x128xf32>
    tpu.vector_store %arg11[%c32_111, %c0_112], %188 {strides = array<i32>} : memref<64x128xf32, #tpu.memory_space<vmem>>, vector<8x128xf32>,
    %c40 = arith.constant 40 : index
    %c0_113 = arith.constant 0 : index
    %192 = vector.load %arg8[%c40, %c0_113] : memref<64x512xf32, #tpu.memory_space<vmem>>, vector<8x512xf32>
    %c0_114 = arith.constant 0 : index
    %c0_115 = arith.constant 0 : index
    %193 = vector.load %arg9[%c0_114, %c0_115] : memref<8x128xf32, #tpu.memory_space<vmem>>, vector<8x128xf32>
    %c0_116 = arith.constant 0 : index
    %c0_117 = arith.constant 0 : index
    %194 = vector.load %arg3[%c0_116, %c0_117] : memref<128x512xf32, #tpu.memory_space<vmem>>, vector<128x512xf32>
    %cst_118 = arith.constant dense<0.000000e+00> : vector<8x512xf32>
    %195 = tpu.matmul %193, %194, %cst_118 {dimension_numbers = #tpu.dot_dimension_numbers<[1], [0], [0], [1], [0, 0, 1, 1], [], []>} : vector<8x128xf32>, vector<128x512xf32>, vector<8x512xf32> -> vector<8x512xf32>
    %196 = arith.addf %192, %195 : vector<8x512xf32>
    %197 = vector.extract_strided_slice %196 {offsets = [0, 0], sizes = [8, 128], strides = [1, 1]} : vector<8x512xf32> to vector<8x128xf32>
    %cst_119 = arith.constant 5.000000e-01 : f32
    %198 = vector.broadcast %cst_119 : f32 to vector<8x128xf32>
    %199 = arith.mulf %198, %197 : vector<8x128xf32>
    %200 = math.tanh %199 : vector<8x128xf32>
    %cst_120 = arith.constant 1.000000e+00 : f32
    %201 = vector.broadcast %cst_120 : f32 to vector<8x128xf32>
    %202 = arith.addf %200, %201 : vector<8x128xf32>
    %cst_121 = arith.constant 5.000000e-01 : f32
    %203 = vector.broadcast %cst_121 : f32 to vector<8x128xf32>
    %204 = arith.mulf %203, %202 : vector<8x128xf32>
    %205 = vector.extract_strided_slice %196 {offsets = [0, 128], sizes = [8, 128], strides = [1, 1]} : vector<8x512xf32> to vector<8x128xf32>
    %cst_122 = arith.constant 5.000000e-01 : f32
    %206 = vector.broadcast %cst_122 : f32 to vector<8x128xf32>
    %207 = arith.mulf %206, %205 : vector<8x128xf32>
    %208 = math.tanh %207 : vector<8x128xf32>
    %cst_123 = arith.constant 1.000000e+00 : f32
    %209 = vector.broadcast %cst_123 : f32 to vector<8x128xf32>
    %210 = arith.addf %208, %209 : vector<8x128xf32>
    %cst_124 = arith.constant 5.000000e-01 : f32
    %211 = vector.broadcast %cst_124 : f32 to vector<8x128xf32>
    %212 = arith.mulf %211, %210 : vector<8x128xf32>
    %213 = vector.extract_strided_slice %196 {offsets = [0, 256], sizes = [8, 128], strides = [1, 1]} : vector<8x512xf32> to vector<8x128xf32>
    %214 = math.tanh %213 : vector<8x128xf32>
    %215 = vector.extract_strided_slice %196 {offsets = [0, 384], sizes = [8, 128], strides = [1, 1]} : vector<8x512xf32> to vector<8x128xf32>
    %cst_125 = arith.constant 5.000000e-01 : f32
    %216 = vector.broadcast %cst_125 : f32 to vector<8x128xf32>
    %217 = arith.mulf %216, %215 : vector<8x128xf32>
    %218 = math.tanh %217 : vector<8x128xf32>
    %cst_126 = arith.constant 1.000000e+00 : f32
    %219 = vector.broadcast %cst_126 : f32 to vector<8x128xf32>
    %220 = arith.addf %218, %219 : vector<8x128xf32>
    %cst_127 = arith.constant 5.000000e-01 : f32
    %221 = vector.broadcast %cst_127 : f32 to vector<8x128xf32>
    %222 = arith.mulf %221, %220 : vector<8x128xf32>
    %c0_128 = arith.constant 0 : index
    %c0_129 = arith.constant 0 : index
    %223 = vector.load %arg10[%c0_128, %c0_129] : memref<8x128xf32, #tpu.memory_space<vmem>>, vector<8x128xf32>
    %224 = arith.mulf %212, %223 : vector<8x128xf32>
    %225 = arith.mulf %204, %214 : vector<8x128xf32>
    %226 = arith.addf %224, %225 : vector<8x128xf32>
    %227 = math.tanh %226 : vector<8x128xf32>
    %228 = arith.mulf %222, %227 : vector<8x128xf32>
    %c0_130 = arith.constant 0 : index
    %c0_131 = arith.constant 0 : index
    %229 = vector.load %arg9[%c0_130, %c0_131] : memref<8x128xf32, #tpu.memory_space<vmem>>, vector<8x128xf32>
    tpu.vector_store %arg9[%c0_130, %c0_131], %228 {strides = array<i32>} : memref<8x128xf32, #tpu.memory_space<vmem>>, vector<8x128xf32>,
    %c0_132 = arith.constant 0 : index
    %c0_133 = arith.constant 0 : index
    %230 = vector.load %arg10[%c0_132, %c0_133] : memref<8x128xf32, #tpu.memory_space<vmem>>, vector<8x128xf32>
    tpu.vector_store %arg10[%c0_132, %c0_133], %226 {strides = array<i32>} : memref<8x128xf32, #tpu.memory_space<vmem>>, vector<8x128xf32>,
    %c40_134 = arith.constant 40 : index
    %c0_135 = arith.constant 0 : index
    %231 = vector.load %arg11[%c40_134, %c0_135] : memref<64x128xf32, #tpu.memory_space<vmem>>, vector<8x128xf32>
    tpu.vector_store %arg11[%c40_134, %c0_135], %228 {strides = array<i32>} : memref<64x128xf32, #tpu.memory_space<vmem>>, vector<8x128xf32>,
    %c48 = arith.constant 48 : index
    %c0_136 = arith.constant 0 : index
    %232 = vector.load %arg8[%c48, %c0_136] : memref<64x512xf32, #tpu.memory_space<vmem>>, vector<8x512xf32>
    %c0_137 = arith.constant 0 : index
    %c0_138 = arith.constant 0 : index
    %233 = vector.load %arg9[%c0_137, %c0_138] : memref<8x128xf32, #tpu.memory_space<vmem>>, vector<8x128xf32>
    %c0_139 = arith.constant 0 : index
    %c0_140 = arith.constant 0 : index
    %234 = vector.load %arg3[%c0_139, %c0_140] : memref<128x512xf32, #tpu.memory_space<vmem>>, vector<128x512xf32>
    %cst_141 = arith.constant dense<0.000000e+00> : vector<8x512xf32>
    %235 = tpu.matmul %233, %234, %cst_141 {dimension_numbers = #tpu.dot_dimension_numbers<[1], [0], [0], [1], [0, 0, 1, 1], [], []>} : vector<8x128xf32>, vector<128x512xf32>, vector<8x512xf32> -> vector<8x512xf32>
    %236 = arith.addf %232, %235 : vector<8x512xf32>
    %237 = vector.extract_strided_slice %236 {offsets = [0, 0], sizes = [8, 128], strides = [1, 1]} : vector<8x512xf32> to vector<8x128xf32>
    %cst_142 = arith.constant 5.000000e-01 : f32
    %238 = vector.broadcast %cst_142 : f32 to vector<8x128xf32>
    %239 = arith.mulf %238, %237 : vector<8x128xf32>
    %240 = math.tanh %239 : vector<8x128xf32>
    %cst_143 = arith.constant 1.000000e+00 : f32
    %241 = vector.broadcast %cst_143 : f32 to vector<8x128xf32>
    %242 = arith.addf %240, %241 : vector<8x128xf32>
    %cst_144 = arith.constant 5.000000e-01 : f32
    %243 = vector.broadcast %cst_144 : f32 to vector<8x128xf32>
    %244 = arith.mulf %243, %242 : vector<8x128xf32>
    %245 = vector.extract_strided_slice %236 {offsets = [0, 128], sizes = [8, 128], strides = [1, 1]} : vector<8x512xf32> to vector<8x128xf32>
    %cst_145 = arith.constant 5.000000e-01 : f32
    %246 = vector.broadcast %cst_145 : f32 to vector<8x128xf32>
    %247 = arith.mulf %246, %245 : vector<8x128xf32>
    %248 = math.tanh %247 : vector<8x128xf32>
    %cst_146 = arith.constant 1.000000e+00 : f32
    %249 = vector.broadcast %cst_146 : f32 to vector<8x128xf32>
    %250 = arith.addf %248, %249 : vector<8x128xf32>
    %cst_147 = arith.constant 5.000000e-01 : f32
    %251 = vector.broadcast %cst_147 : f32 to vector<8x128xf32>
    %252 = arith.mulf %251, %250 : vector<8x128xf32>
    %253 = vector.extract_strided_slice %236 {offsets = [0, 256], sizes = [8, 128], strides = [1, 1]} : vector<8x512xf32> to vector<8x128xf32>
    %254 = math.tanh %253 : vector<8x128xf32>
    %255 = vector.extract_strided_slice %236 {offsets = [0, 384], sizes = [8, 128], strides = [1, 1]} : vector<8x512xf32> to vector<8x128xf32>
    %cst_148 = arith.constant 5.000000e-01 : f32
    %256 = vector.broadcast %cst_148 : f32 to vector<8x128xf32>
    %257 = arith.mulf %256, %255 : vector<8x128xf32>
    %258 = math.tanh %257 : vector<8x128xf32>
    %cst_149 = arith.constant 1.000000e+00 : f32
    %259 = vector.broadcast %cst_149 : f32 to vector<8x128xf32>
    %260 = arith.addf %258, %259 : vector<8x128xf32>
    %cst_150 = arith.constant 5.000000e-01 : f32
    %261 = vector.broadcast %cst_150 : f32 to vector<8x128xf32>
    %262 = arith.mulf %261, %260 : vector<8x128xf32>
    %c0_151 = arith.constant 0 : index
    %c0_152 = arith.constant 0 : index
    %263 = vector.load %arg10[%c0_151, %c0_152] : memref<8x128xf32, #tpu.memory_space<vmem>>, vector<8x128xf32>
    %264 = arith.mulf %252, %263 : vector<8x128xf32>
    %265 = arith.mulf %244, %254 : vector<8x128xf32>
    %266 = arith.addf %264, %265 : vector<8x128xf32>
    %267 = math.tanh %266 : vector<8x128xf32>
    %268 = arith.mulf %262, %267 : vector<8x128xf32>
    %c0_153 = arith.constant 0 : index
    %c0_154 = arith.constant 0 : index
    %269 = vector.load %arg9[%c0_153, %c0_154] : memref<8x128xf32, #tpu.memory_space<vmem>>, vector<8x128xf32>
    tpu.vector_store %arg9[%c0_153, %c0_154], %268 {strides = array<i32>} : memref<8x128xf32, #tpu.memory_space<vmem>>, vector<8x128xf32>,
    %c0_155 = arith.constant 0 : index
    %c0_156 = arith.constant 0 : index
    %270 = vector.load %arg10[%c0_155, %c0_156] : memref<8x128xf32, #tpu.memory_space<vmem>>, vector<8x128xf32>
    tpu.vector_store %arg10[%c0_155, %c0_156], %266 {strides = array<i32>} : memref<8x128xf32, #tpu.memory_space<vmem>>, vector<8x128xf32>,
    %c48_157 = arith.constant 48 : index
    %c0_158 = arith.constant 0 : index
    %271 = vector.load %arg11[%c48_157, %c0_158] : memref<64x128xf32, #tpu.memory_space<vmem>>, vector<8x128xf32>
    tpu.vector_store %arg11[%c48_157, %c0_158], %268 {strides = array<i32>} : memref<64x128xf32, #tpu.memory_space<vmem>>, vector<8x128xf32>,
    %c56 = arith.constant 56 : index
    %c0_159 = arith.constant 0 : index
    %272 = vector.load %arg8[%c56, %c0_159] : memref<64x512xf32, #tpu.memory_space<vmem>>, vector<8x512xf32>
    %c0_160 = arith.constant 0 : index
    %c0_161 = arith.constant 0 : index
    %273 = vector.load %arg9[%c0_160, %c0_161] : memref<8x128xf32, #tpu.memory_space<vmem>>, vector<8x128xf32>
    %c0_162 = arith.constant 0 : index
    %c0_163 = arith.constant 0 : index
    %274 = vector.load %arg3[%c0_162, %c0_163] : memref<128x512xf32, #tpu.memory_space<vmem>>, vector<128x512xf32>
    %cst_164 = arith.constant dense<0.000000e+00> : vector<8x512xf32>
    %275 = tpu.matmul %273, %274, %cst_164 {dimension_numbers = #tpu.dot_dimension_numbers<[1], [0], [0], [1], [0, 0, 1, 1], [], []>} : vector<8x128xf32>, vector<128x512xf32>, vector<8x512xf32> -> vector<8x512xf32>
    %276 = arith.addf %272, %275 : vector<8x512xf32>
    %277 = vector.extract_strided_slice %276 {offsets = [0, 0], sizes = [8, 128], strides = [1, 1]} : vector<8x512xf32> to vector<8x128xf32>
    %cst_165 = arith.constant 5.000000e-01 : f32
    %278 = vector.broadcast %cst_165 : f32 to vector<8x128xf32>
    %279 = arith.mulf %278, %277 : vector<8x128xf32>
    %280 = math.tanh %279 : vector<8x128xf32>
    %cst_166 = arith.constant 1.000000e+00 : f32
    %281 = vector.broadcast %cst_166 : f32 to vector<8x128xf32>
    %282 = arith.addf %280, %281 : vector<8x128xf32>
    %cst_167 = arith.constant 5.000000e-01 : f32
    %283 = vector.broadcast %cst_167 : f32 to vector<8x128xf32>
    %284 = arith.mulf %283, %282 : vector<8x128xf32>
    %285 = vector.extract_strided_slice %276 {offsets = [0, 128], sizes = [8, 128], strides = [1, 1]} : vector<8x512xf32> to vector<8x128xf32>
    %cst_168 = arith.constant 5.000000e-01 : f32
    %286 = vector.broadcast %cst_168 : f32 to vector<8x128xf32>
    %287 = arith.mulf %286, %285 : vector<8x128xf32>
    %288 = math.tanh %287 : vector<8x128xf32>
    %cst_169 = arith.constant 1.000000e+00 : f32
    %289 = vector.broadcast %cst_169 : f32 to vector<8x128xf32>
    %290 = arith.addf %288, %289 : vector<8x128xf32>
    %cst_170 = arith.constant 5.000000e-01 : f32
    %291 = vector.broadcast %cst_170 : f32 to vector<8x128xf32>
    %292 = arith.mulf %291, %290 : vector<8x128xf32>
    %293 = vector.extract_strided_slice %276 {offsets = [0, 256], sizes = [8, 128], strides = [1, 1]} : vector<8x512xf32> to vector<8x128xf32>
    %294 = math.tanh %293 : vector<8x128xf32>
    %295 = vector.extract_strided_slice %276 {offsets = [0, 384], sizes = [8, 128], strides = [1, 1]} : vector<8x512xf32> to vector<8x128xf32>
    %cst_171 = arith.constant 5.000000e-01 : f32
    %296 = vector.broadcast %cst_171 : f32 to vector<8x128xf32>
    %297 = arith.mulf %296, %295 : vector<8x128xf32>
    %298 = math.tanh %297 : vector<8x128xf32>
    %cst_172 = arith.constant 1.000000e+00 : f32
    %299 = vector.broadcast %cst_172 : f32 to vector<8x128xf32>
    %300 = arith.addf %298, %299 : vector<8x128xf32>
    %cst_173 = arith.constant 5.000000e-01 : f32
    %301 = vector.broadcast %cst_173 : f32 to vector<8x128xf32>
    %302 = arith.mulf %301, %300 : vector<8x128xf32>
    %c0_174 = arith.constant 0 : index
    %c0_175 = arith.constant 0 : index
    %303 = vector.load %arg10[%c0_174, %c0_175] : memref<8x128xf32, #tpu.memory_space<vmem>>, vector<8x128xf32>
    %304 = arith.mulf %292, %303 : vector<8x128xf32>
    %305 = arith.mulf %284, %294 : vector<8x128xf32>
    %306 = arith.addf %304, %305 : vector<8x128xf32>
    %307 = math.tanh %306 : vector<8x128xf32>
    %308 = arith.mulf %302, %307 : vector<8x128xf32>
    %c0_176 = arith.constant 0 : index
    %c0_177 = arith.constant 0 : index
    %309 = vector.load %arg9[%c0_176, %c0_177] : memref<8x128xf32, #tpu.memory_space<vmem>>, vector<8x128xf32>
    tpu.vector_store %arg9[%c0_176, %c0_177], %308 {strides = array<i32>} : memref<8x128xf32, #tpu.memory_space<vmem>>, vector<8x128xf32>,
    %c0_178 = arith.constant 0 : index
    %c0_179 = arith.constant 0 : index
    %310 = vector.load %arg10[%c0_178, %c0_179] : memref<8x128xf32, #tpu.memory_space<vmem>>, vector<8x128xf32>
    tpu.vector_store %arg10[%c0_178, %c0_179], %306 {strides = array<i32>} : memref<8x128xf32, #tpu.memory_space<vmem>>, vector<8x128xf32>,
    %c56_180 = arith.constant 56 : index
    %c0_181 = arith.constant 0 : index
    %311 = vector.load %arg11[%c56_180, %c0_181] : memref<64x128xf32, #tpu.memory_space<vmem>>, vector<8x128xf32>
    tpu.vector_store %arg11[%c56_180, %c0_181], %308 {strides = array<i32>} : memref<64x128xf32, #tpu.memory_space<vmem>>, vector<8x128xf32>,
    %c0_182 = arith.constant 0 : index
    %c0_183 = arith.constant 0 : index
    %312 = vector.load %arg11[%c0_182, %c0_183] : memref<64x128xf32, #tpu.memory_space<vmem>>, vector<64x128xf32>
    %c0_184 = arith.constant 0 : index
    %c0_185 = arith.constant 0 : index
    %313 = vector.load %arg5[%c0_184, %c0_185] : memref<128x128xf32, #tpu.memory_space<vmem>>, vector<128x128xf32>
    %cst_186 = arith.constant dense<0.000000e+00> : vector<64x128xf32>
    %314 = tpu.matmul %312, %313, %cst_186 {dimension_numbers = #tpu.dot_dimension_numbers<[1], [0], [0], [1], [0, 0, 1, 1], [], []>} : vector<64x128xf32>, vector<128x128xf32>, vector<64x128xf32> -> vector<64x128xf32>
    %c0_187 = arith.constant 0 : index
    %c0_188 = arith.constant 0 : index
    %315 = vector.load %arg6[%c0_187, %c0_188] : memref<1x128xf32, #tpu.memory_space<vmem>>, vector<1x128xf32>
    %316 = vector.broadcast %315 : vector<1x128xf32> to vector<64x128xf32>
    %317 = arith.addf %314, %316 : vector<64x128xf32>
    %318 = math.tanh %317 : vector<64x128xf32>
    %c0_189 = arith.constant 0 : index
    %c0_190 = arith.constant 0 : index
    %319 = vector.load %arg7[%c0_189, %c0_190] : memref<64x128xf32, #tpu.memory_space<vmem>>, vector<64x128xf32>
    tpu.vector_store %arg7[%c0_189, %c0_190], %318 {strides = array<i32>} : memref<64x128xf32, #tpu.memory_space<vmem>>, vector<64x128xf32>,
    return
  }
  func.func @transform_0(%arg0: i32) -> (i32, i32) {
    %c0_i32 = arith.constant 0 : i32
    %c0_i32_0 = arith.constant 0 : i32
    %c0_i32_1 = arith.constant 0 : i32
    return %c0_i32, %c0_i32_0 : i32, i32
  }
  func.func @transform_1(%arg0: i32) -> (i32, i32) {
    %c0_i32 = arith.constant 0 : i32
    %c0_i32_0 = arith.constant 0 : i32
    %c0_i32_1 = arith.constant 0 : i32
    return %c0_i32, %c0_i32_0 : i32, i32
  }
  func.func @transform_2(%arg0: i32) -> (i32, i32) {
    %c0_i32 = arith.constant 0 : i32
    %c0_i32_0 = arith.constant 0 : i32
    %c0_i32_1 = arith.constant 0 : i32
    return %c0_i32, %c0_i32_0 : i32, i32
  }
  func.func @transform_3(%arg0: i32) -> (i32, i32) {
    %c0_i32 = arith.constant 0 : i32
    %c0_i32_0 = arith.constant 0 : i32
    %c0_i32_1 = arith.constant 0 : i32
    return %c0_i32, %c0_i32_0 : i32, i32
  }
  func.func @transform_4(%arg0: i32) -> (i32, i32) {
    %c0_i32 = arith.constant 0 : i32
    %c0_i32_0 = arith.constant 0 : i32
    %c0_i32_1 = arith.constant 0 : i32
    return %c0_i32, %c0_i32_0 : i32, i32
  }
  func.func @transform_5(%arg0: i32) -> (i32, i32) {
    %c0_i32 = arith.constant 0 : i32
    %c0_i32_0 = arith.constant 0 : i32
    %c0_i32_1 = arith.constant 0 : i32
    return %c0_i32, %c0_i32_0 : i32, i32
  }
  func.func @transform_6(%arg0: i32) -> (i32, i32) {
    %c0_i32 = arith.constant 0 : i32
    %c0_i32_0 = arith.constant 0 : i32
    %c0_i32_1 = arith.constant 0 : i32
    return %c0_i32, %c0_i32_0 : i32, i32
  }
}

</mosaic_0001>

<bundles_post_ra>
// kernel: tpu_custom_call.1
= control target key start
LH: loop header
LB: loop body
LE: loop exit
PB: predicated region body
PF: predicated region fallthrough
CT: control target
= control target key end

     0   :  { %11 = vsyncpa [#allocation7], 0  ;;  %s2924_s0 = inlined_call_operand.vmem [shape: f32[64,16], index: 0, kind: input, shape index: {}]   ;;  %s2925_s1 = inlined_call_operand.vmem [shape: f32[16,512], index: 1, kind: input, shape index: {}]   ;;  %s2926_s2 = inlined_call_operand.hbm [shape: f32[128,512], index: 2, kind: input, shape index: {}]   ;;  %s2927_s3 = inlined_call_operand.vmem [shape: f32[1,512], index: 3, kind: input, shape index: {}]   ;;  %s2928_s4 = inlined_call_operand.hbm [shape: f32[128,128], index: 4, kind: input, shape index: {}]   ;;  %s2929_s5 = inlined_call_operand.vmem [shape: f32[1,128], index: 5, kind: input, shape index: {}]   ;;  %s2930_s6 = inlined_call_operand.hbm [shape: f32[64,128], index: 6, kind: output, shape index: {}]  }
   0x1   :  { %12 = vsyncpa [#allocation10], 0 }
   0x2   :  { %13 = vsyncpa [#allocation8], 0  ;;  %s22_s23 = sshll.u32 %s2926_s2, 4  ;;  %s1867_s24 = smov [#allocation6]   ;;  %s23_s23 = int_to_ptr.hbm [resolvable:$true] %s22_s23 }
   0x3   :  { %s24_s25 = sshll.u32 %s1867_s24, 4  ;;  %s37_s28 = sshll.u32 %s2928_s4, 4  ;;  %s25_s25 = int_to_ptr.vmem [resolvable:$true] %s24_s25  ;;  %s38_s28 = int_to_ptr.hbm [resolvable:$true] %s37_s28 }
   0x4   :  { %s1868_s29 = smov 512   ;;  %s1869_s30 = smov 32  }
   0x5   :  { %30 = dma.hbm_to_vmem [thread:$0]  %s23_s23, 8192, %s25_s25, [#allocation7], %s1868_s29, %s1868_s29, %s1869_s30  }
   0x6   :  { %s1870_s7 = smov [#allocation9]   ;;  %s1871_s9 = smov 128  }
   0x7   :  { %s39_s8 = sshll.u32 %s1870_s7, 4  ;;  %s1872_s10 = smov 8   ;;  %s40_s8 = int_to_ptr.vmem [resolvable:$true] %s39_s8 }
   0x8   :  { %45 = dma.hbm_to_vmem [thread:$0]  %s38_s28, 2048, %s40_s8, [#allocation10], %s1871_s9, %s1871_s9, %s1872_s10  }
   0x9   :  { %1861 = dma.done.wait [#allocation7], 8192  }
   0xa   :  { %1862 = vsyncadd [#allocation7], 4294959104 }
   0xb   :  { %1863 = dma.done.wait [#allocation10], 2048  }
   0xc   :  { %1864 = vsyncadd [#allocation10], 4294965248  ;;  %v68_v0 = vld [vmem:[%s2925_s1 + $0x20] sm:$0xff]  ;;  %v1927_v2 = vld [vmem:[%s2924_s0 + $0x28] sm:$0xff]  ;;  %vm82_vm0 = vcmask 130048   ;;  %s1637_s21 = sshll.u32 %s2930_s6, 4  ;;  %s1638_s21 = int_to_ptr.hbm [resolvable:$true] %s1637_s21 }
   0xd   :  { %v64_v1 = vld [vmem:[%s2925_s1] sm:$0xff]  ;;  %1684 = vmatpush.msra.mxu3 %v68_v0  ;;  %121 = vmatpush.msra.mxu0 %v68_v0  ;;  %v71_v3 = vld [vmem:[%s2925_s1 + $0x38] sm:$0xff]  ;;  %v70_v4 = vld [vmem:[%s2925_s1 + $0x30] sm:$0xff] }
   0xe   :  { %v66_v5 = vld [vmem:[%s2925_s1 + $0x10] sm:$0xff]  ;;  %1683 = vmatpush.msra.mxu1 %v68_v0  ;;  %203 = vmatpush.msra.mxu2 %v70_v4  ;;  %v56_v6 = vld [vmem:[%s2924_s0] sm:$0xff]  ;;  %v67_v7 = vld [vmem:[%s2925_s1 + $0x18] sm:$0xff] }
   0xf   :  { %1686 = vmatpush.msra.mxu3 %v64_v1  ;;  %122 = vmatpush.msra.mxu0 %v64_v1  ;;  %v1949_v8 = vld [vmem:[%s2924_s0 + $0x20] sm:$0xff]  ;;  %v69_v10 = vld [vmem:[%s2925_s1 + $0x28] sm:$0xff]  ;;  %v1958_v11 = vld [vmem:[#allocation6 + $0x1f8] sm:$0xff] }
  0x10   :  { %1656 = vmatmul.msk.f32.vlgmr.msra.gmra.mxu3 %vm82_vm0, %v1927_v2  ;;  %204 = vmatpush.msra.mxu2 %v66_v5  ;;  %v1951_v9 = vld [vmem:[#allocation6 + $0x1e0] sm:$0xff]  ;;  %v65_v13 = vld [vmem:[%s2925_s1 + $0x8] sm:$0xff]  ;;  %v1971_v14 = vld [vmem:[%s2924_s0 + $0x30] sm:$0xff] }
  0x11   :  { %244 = vmatpush.msrb.mxu3 %v71_v3  ;;  %1651 = vmatmul.msk.f32.vlgmr.msra.gmra.mxu0 %vm82_vm0, %v56_v6  ;;  %v1960_v12 = vld [vmem:[#allocation6 + $0x1c0] sm:$0xff]  ;;  %v1977_v16 = vld [vmem:[#allocation6 + $0x1e8] sm:$0xff]  ;;  %v1990_v20 = vld [vmem:[#allocation6 + $0x1d8] sm:$0xff] }
  0x12   :  { %1667 = vmatmul.msk.f32.vlgmr.msra.gmra.mxu2 %vm82_vm0, %v56_v6  ;;  %1685 = vmatpush.msra.mxu1 %v64_v1  ;;  %v1973_v15 = vld [vmem:[#allocation6 + $0x1a0] sm:$0xff]  ;;  %v57_v17 = vld [vmem:[%s2924_s0 + $0x8] sm:$0xff]  ;;  %v1994_v21 = vld [vmem:[#allocation6 + $0x1b8] sm:$0xff] }
  0x13   :  { %245 = vmatpush.msrb.mxu3 %v67_v7  ;;  %1655 = vmatmul.msk.f32.vlgmr.msra.gmra.mxu1 %vm82_vm0, %v1949_v8  ;;  %v1986_v18 = vld [vmem:[#allocation6 + $0x180] sm:$0xff]  ;;  %v1988_v19 = vld [vmem:[#allocation6 + $0x1c8] sm:$0xff]  ;;  %v2013_v26 = vld [vmem:[%s2924_s0 + $0x38] sm:$0xff] }
  0x14   :  { %390 = vmatpush.msrb.mxu2 %v1951_v9  ;;  %162 = vmatpush.msrb.mxu1 %v69_v10  ;;  %v1997_v22 = vld [vmem:[#allocation6 + $0x160] sm:$0xff]  ;;  %v1999_v23 = vld [vmem:[#allocation6 + $0x1a8] sm:$0xff]  ;;  %v58_v27 = vld [vmem:[%s2924_s0 + $0x10] sm:$0xff] }
  0x15   :  { %450 = vmatpush.msra.mxu3 %v1958_v11  ;;  %565 = vmatpush.msrb.mxu0 %v1951_v9  ;;  %v2005_v24 = vld [vmem:[#allocation6 + $0x140] sm:$0xff]  ;;  %v2007_v25 = vld [vmem:[#allocation6 + $0x188] sm:$0xff]  ;;  %v59_v29 = vld [vmem:[%s2924_s0 + $0x18] sm:$0xff] }
  0x16   :  { %391 = vmatpush.msrb.mxu2 %v1960_v12  ;;  %163 = vmatpush.msrb.mxu1 %v65_v13  ;;  %v2036_v28 = vld [vmem:[#allocation6 + $0x120] sm:$0xff]  ;;  %v2045_v31 = vld [vmem:[#allocation6 + $0x168] sm:$0xff]  ;;  %v2049_v32 = vld [vmem:[#allocation6 + $0x198] sm:$0xff] }
  0x17   :  { %451 = vmatpush.msra.mxu3 %v1990_v20  ;;  %566 = vmatpush.msrb.mxu0 %v1960_v12  ;;  %v2043_v30 = vld [vmem:[#allocation6 + $0x100] sm:$0xff]  ;;  %v2055_v34 = vld [vmem:[#allocation6 + $0x148] sm:$0xff]  ;;  %v2057_v35 = vld [vmem:[#allocation6 + $0x178] sm:$0xff] }
  0x18   :  { %1657 = vmatmul.msk.f32.gmra.mxu3 %vm82_vm0, %v1971_v14  ;;  %392 = vmatpush.msrb.mxu2 %v1973_v15  ;;  %v2051_v33 = vld [vmem:[#allocation6 + $0xe0] sm:$0xff]  ;;  %v2075_v39 = vld [vmem:[#allocation6 + $0x128] sm:$0xff]  ;;  %v2077_v40 = vld [vmem:[#allocation6 + $0x158] sm:$0xff] }
  0x19   :  { %410 = vmatpush.msra.mxu1 %v1977_v16  ;;  %1652 = vmatmul.msk.f32.gmra.mxu0 %vm82_vm0, %v57_v17  ;;  %v2061_v36 = vld [vmem:[#allocation6 + $0xc0] sm:$0xff]  ;;  %v2089_v42 = vld [vmem:[#allocation6 + $0x108] sm:$0xff]  ;;  %v2091_v43 = vld [vmem:[#allocation6 + $0x138] sm:$0xff] }
  0x1a   :  { %1668 = vmatmul.msk.f32.gmra.mxu2 %vm82_vm0, %v57_v17  ;;  %452 = vmatpush.msra.mxu3 %v1994_v21  ;;  %v2068_v37 = vld [vmem:[#allocation6 + $0xa0] sm:$0xff]  ;;  %v2108_v47 = vld [vmem:[#allocation6 + $0xe8] sm:$0xff]  ;;  %v2110_v48 = vld [vmem:[#allocation6 + $0x1f0] sm:$0xff] }
  0x1b   :  { %393 = vmatpush.msrb.mxu2 %v1986_v18  ;;  %411 = vmatpush.msra.mxu1 %v1988_v19  ;;  %v2073_v38 = vld [vmem:[#allocation6 + $0x80] sm:$0xff]  ;;  %v2117_v49 = vld [vmem:[#allocation6 + $0x118] sm:$0xff]  ;;  %v2122_v50 = vld [vmem:[#allocation6 + $0x1d0] sm:$0xff] }
  0x1c   :  { %1659 = vmatmul.msk.f32.vlgmr.msrb.gmra.mxu1 %vm82_vm0, %v56_v6  ;;  %567 = vmatpush.msrb.mxu0 %v1973_v15  ;;  %v2084_v41 = vld [vmem:[#allocation6 + $0x60] sm:$0xff]  ;;  %v2124_v51 = vld [vmem:[#allocation6 + $0xc8] sm:$0xff]  ;;  %v2128_v52 = vld [vmem:[#allocation6 + $0xf8] sm:$0xff] }
  0x1d   :  { %394 = vmatpush.msrb.mxu2 %v1997_v22  ;;  %412 = vmatpush.msra.mxu1 %v1999_v23  ;;  %v2095_v44 = vld [vmem:[#allocation6 + $0x40] sm:$0xff]  ;;  %v2131_v53 = vld [vmem:[#allocation6 + $0x1b0] sm:$0xff]  ;;  %v2152_v56 = vld [vmem:[#allocation6 + $0xd8] sm:$0xff] }
  0x1e   :  { %568 = vmatpush.msrb.mxu0 %v1986_v18  ;;  %453 = vmatpush.msra.mxu3 %v2049_v32  ;;  %v2102_v45 = vld [vmem:[#allocation6 + $0x20] sm:$0xff]  ;;  %v2139_v54 = vld [vmem:[#allocation6 + $0x190] sm:$0xff]  ;;  %v2163_v59 = vld [vmem:[#allocation6 + $0xa8] sm:$0xff] }
  0x1f   :  { %395 = vmatpush.msrb.mxu2 %v2005_v24  ;;  %413 = vmatpush.msra.mxu1 %v2007_v25  ;;  %v2106_v46 = vld [vmem:[#allocation6] sm:$0xff]  ;;  %v2145_v55 = vld [vmem:[#allocation6 + $0x170] sm:$0xff]  ;;  %v2168_v61 = vld [vmem:[#allocation6 + $0xb8] sm:$0xff] }
  0x20   :  { %1658 = vmatmul.msk.f32.gmra.mxu3 %vm82_vm0, %v2013_v26  ;;  %569 = vmatpush.msrb.mxu0 %v1997_v22  ;;  %v2154_v57 = vld [vmem:[#allocation6 + $0x150] sm:$0xff]  ;;  %v2160_v58 = vld [vmem:[%s2927_s3] sm:$0xf]  ;;  %v2178_v1 = vld [vmem:[#allocation6 + $0x88] sm:$0xff] }
  0x21   :  { %1653 = vmatmul.msk.f32.gmra.mxu0 %vm82_vm0, %v58_v27  ;;  %396 = vmatpush.msrb.mxu2 %v2036_v28  ;;  %v2166_v60 = vld [vmem:[#allocation6 + $0x130] sm:$0xff]  ;;  %v2174_v63 = vperm.slane %v2160_v58, 0  ;;  %v2183_v3 = vld [vmem:[#allocation6 + $0x98] sm:$0xff]  ;;  %v2192_v5 = vld [vmem:[#allocation6 + $0x68] sm:$0xff] }
  0x22   :  { %1669 = vmatmul.msk.f32.gmra.mxu2 %vm82_vm0, %v58_v27  ;;  %570 = vmatpush.msrb.mxu0 %v2005_v24  ;;  %v2196_v7 = vld [vmem:[#allocation6 + $0x78] sm:$0xff]  ;;  %v2214_v13 = vld [vmem:[#allocation6 + $0x28] sm:$0xff] }
  0x23   :  { %397 = vmatpush.msrb.mxu2 %v2043_v30  ;;  %414 = vmatpush.msra.mxu1 %v2045_v31  ;;  %2961 = vst [vmem:[#allocation15_spill] sm:$0xff] %v2174_v63  ;;  %v2208_v10 = vld [vmem:[#allocation6 + $0x58] sm:$0xff] }
  0x24   :  { %1660 = vmatmul.msk.f32.gmra.mxu1 %vm82_vm0, %v57_v17  ;;  %571 = vmatpush.msrb.mxu0 %v2036_v28 }
  0x25   :  { %398 = vmatpush.msrb.mxu2 %v2051_v33  ;;  %415 = vmatpush.msra.mxu1 %v2055_v34 }
  0x26   :  { %572 = vmatpush.msrb.mxu0 %v2043_v30  ;;  %454 = vmatpush.msra.mxu3 %v2057_v35 }
  0x27   :  { %399 = vmatpush.msrb.mxu2 %v2061_v36  ;;  %416 = vmatpush.msra.mxu1 %v2075_v39 }
  0x28   :  { %1675 = vmatmul.msk.f32.vlgmr.msrb.gmra.mxu3 %vm82_vm0, %v56_v6  ;;  %573 = vmatpush.msrb.mxu0 %v2051_v33  ;;  %v2194_v6 = vld [vmem:[#allocation6 + $0xf0] sm:$0xff] }
  0x29   :  { %1654 = vmatmul.msk.f32.gmra.mxu0 %vm82_vm0, %v59_v29  ;;  %400 = vmatpush.msrb.mxu2 %v2068_v37 }
  0x2a   :  { %1670 = vmatmul.msk.f32.gmra.mxu2 %vm82_vm0, %v59_v29  ;;  %574 = vmatpush.msrb.mxu0 %v2061_v36 }
  0x2b   :  { %401 = vmatpush.msrb.mxu2 %v2073_v38  ;;  %455 = vmatpush.msra.mxu3 %v2077_v40 }
  0x2c   :  { %1661 = vmatmul.msk.f32.gmra.mxu1 %vm82_vm0, %v58_v27  ;;  %575 = vmatpush.msrb.mxu0 %v2068_v37 }
  0x2d   :  { %402 = vmatpush.msrb.mxu2 %v2084_v41  ;;  %417 = vmatpush.msra.mxu1 %v2089_v42 }
  0x2e   :  { %456 = vmatpush.msra.mxu3 %v2091_v43  ;;  %576 = vmatpush.msrb.mxu0 %v2073_v38 }
  0x2f   :  { %403 = vmatpush.msrb.mxu2 %v2095_v44  ;;  %418 = vmatpush.msra.mxu1 %v2108_v47 }
  0x30   :  { %1676 = vmatmul.msk.f32.gmra.mxu3 %vm82_vm0, %v57_v17  ;;  %577 = vmatpush.msrb.mxu0 %v2084_v41 }
  0x31   :  { %404 = vmatpush.msrb.mxu2 %v2102_v45  ;;  %457 = vmatpush.msra.mxu3 %v2117_v49 }
  0x32   :  { %1671 = vmatmul.msk.f32.gmra.mxu2 %vm82_vm0, %v1949_v8  ;;  %578 = vmatpush.msrb.mxu0 %v2095_v44 }
  0x33   :  { %405 = vmatpush.msrb.mxu2 %v2106_v46  ;;  %419 = vmatpush.msra.mxu1 %v2124_v51 }
  0x34   :  { %1662 = vmatmul.msk.f32.gmra.mxu1 %vm82_vm0, %v59_v29  ;;  %458 = vmatpush.msra.mxu3 %v2128_v52 }
  0x35   :  { %430 = vmatpush.msra.mxu2 %v2110_v48  ;;  %579 = vmatpush.msrb.mxu0 %v2102_v45 }
  0x36   :  { %459 = vmatpush.msra.mxu3 %v2152_v56  ;;  %420 = vmatpush.msra.mxu1 %v2163_v59 }
  0x37   :  { %431 = vmatpush.msra.mxu2 %v2122_v50  ;;  %580 = vmatpush.msrb.mxu0 %v2106_v46 }
  0x38   :  { %1677 = vmatmul.msk.f32.gmra.mxu3 %vm82_vm0, %v58_v27  ;;  %421 = vmatpush.msra.mxu1 %v2178_v1  ;;  %v2230_v27 = vld [vmem:[#allocation6 + $0x18] sm:$0xff] }
  0x39   :  { %432 = vmatpush.msra.mxu2 %v2131_v53  ;;  %740 = vmatpush.msra.mxu0 %v1951_v9  ;;  %v2206_v9 = vld [vmem:[#allocation6 + $0xd0] sm:$0xff] }
  0x3a   :  { %1672 = vmatmul.msk.f32.gmra.mxu2 %vm82_vm0, %v1927_v2  ;;  %460 = vmatpush.msra.mxu3 %v2168_v61 }
  0x3b   :  { %433 = vmatpush.msra.mxu2 %v2139_v54  ;;  %741 = vmatpush.msra.mxu0 %v1960_v12 }
  0x3c   :  { %1663 = vmatmul.msk.f32.gmra.mxu1 %vm82_vm0, %v1949_v8  ;;  %461 = vmatpush.msra.mxu3 %v2183_v3 }
  0x3d   :  { %434 = vmatpush.msra.mxu2 %v2145_v55  ;;  %742 = vmatpush.msra.mxu0 %v1973_v15  ;;  %v2218_v15 = vld [vmem:[#allocation6 + $0x38] sm:$0xff] }
  0x3e   :  { %422 = vmatpush.msra.mxu1 %v2192_v5  ;;  %462 = vmatpush.msra.mxu3 %v2196_v7 }
  0x3f   :  { %435 = vmatpush.msra.mxu2 %v2154_v57  ;;  %743 = vmatpush.msra.mxu0 %v1986_v18  ;;  %v2226_v18 = vld [vmem:[#allocation6 + $0x8] sm:$0xff] }
  0x40   :  { %1678 = vmatmul.msk.f32.gmra.mxu3 %vm82_vm0, %v59_v29  ;;  %v2235_v29 = vperm.slane %v2160_v58, 2 }
  0x41   :  { %436 = vmatpush.msra.mxu2 %v2166_v60  ;;  %463 = vmatpush.msra.mxu3 %v2208_v10 }
  0x42   :  { %1673 = vmatmul.msk.f32.gmra.mxu2 %vm82_vm0, %v1971_v14  ;;  %744 = vmatpush.msra.mxu0 %v1997_v22 }
  0x43   :  { %464 = vmatpush.msra.mxu3 %v2218_v15 }
  0x44   :  { %1664 = vmatmul.msk.f32.gmra.mxu1 %vm82_vm0, %v1927_v2  ;;  %745 = vmatpush.msra.mxu0 %v2005_v24  ;;  %v2247_v24 = vld [vmem:[#allocation6 + $0x30] sm:$0xff] }
  0x45   :  { %465 = vmatpush.msra.mxu3 %v2230_v27 }
  0x46   :  { %746 = vmatpush.msra.mxu0 %v2036_v28 }
  0x47   :  { %625 = vmatpush.msrb.mxu3 %v1958_v11 }
  0x48   :  { %1679 = vmatmul.msk.f32.gmra.mxu3 %vm82_vm0, %v1949_v8  ;;  %v2204_v8 = vld [vmem:[#allocation6 + $0x48] sm:$0xff]  ;;  %747 = vmatpush.msra.mxu0 %v2043_v30  ;;  %v2272_v30 = vperm.slane %v2160_v58, 3 }
  0x49   :  { %423 = vmatpush.msra.mxu1 %v2204_v8  ;;  %626 = vmatpush.msrb.mxu3 %v1990_v20 }
  0x4a   :  { %1674 = vmatmul.msk.f32.gmra.mxu2 %vm82_vm0, %v2013_v26  ;;  %748 = vmatpush.msra.mxu0 %v2051_v33 }
  0x4b   :  { %424 = vmatpush.msra.mxu1 %v2214_v13  ;;  %627 = vmatpush.msrb.mxu3 %v1994_v21 }
  0x4c   :  { %1665 = vmatmul.msk.f32.gmra.mxu1 %vm82_vm0, %v1971_v14  ;;  %749 = vmatpush.msra.mxu0 %v2061_v36 }
  0x4d   :  { %425 = vmatpush.msra.mxu1 %v2226_v18  ;;  %628 = vmatpush.msrb.mxu3 %v2049_v32 }
  0x4e   :  { %750 = vmatpush.msra.mxu0 %v2068_v37 }
  0x4f   :  { %585 = vmatpush.msrb.mxu1 %v1977_v16  ;;  %629 = vmatpush.msrb.mxu3 %v2057_v35 }
  0x50   :  { %1680 = vmatmul.msk.f32.gmra.mxu3 %vm82_vm0, %v1927_v2  ;;  %v2181_v2 = vld [vmem:[#allocation6 + $0x110] sm:$0xff]  ;;  %751 = vmatpush.msra.mxu0 %v2073_v38 }
  0x51   :  { %437 = vmatpush.msra.mxu2 %v2181_v2  ;;  %586 = vmatpush.msrb.mxu1 %v1988_v19 }
  0x52   :  { %630 = vmatpush.msrb.mxu3 %v2077_v40  ;;  %752 = vmatpush.msra.mxu0 %v2084_v41 }
  0x53   :  { %438 = vmatpush.msra.mxu2 %v2194_v6  ;;  %587 = vmatpush.msrb.mxu1 %v1999_v23 }
  0x54   :  { %1666 = vmatmul.msk.f32.gmra.mxu1 %vm82_vm0, %v2013_v26  ;;  %631 = vmatpush.msrb.mxu3 %v2091_v43 }
  0x55   :  { %439 = vmatpush.msra.mxu2 %v2206_v9  ;;  %588 = vmatpush.msrb.mxu1 %v2007_v25 }
  0x56   :  { %632 = vmatpush.msrb.mxu3 %v2117_v49  ;;  %753 = vmatpush.msra.mxu0 %v2095_v44 }
  0x57   :  { %589 = vmatpush.msrb.mxu1 %v2045_v31 }
  0x58   :  { %1681 = vmatmul.msk.f32.gmra.mxu3 %vm82_vm0, %v1971_v14  ;;  %v2216_v14 = vld [vmem:[#allocation6 + $0xb0] sm:$0xff]  ;;  %754 = vmatpush.msra.mxu0 %v2102_v45 }
  0x59   :  { %440 = vmatpush.msra.mxu2 %v2216_v14  ;;  %590 = vmatpush.msrb.mxu1 %v2055_v34 }
  0x5a   :  { %633 = vmatpush.msrb.mxu3 %v2128_v52  ;;  %755 = vmatpush.msra.mxu0 %v2106_v46 }
  0x5b   :  { %591 = vmatpush.msrb.mxu1 %v2075_v39 }
  0x5c   :  { %634 = vmatpush.msrb.mxu3 %v2152_v56 }
  0x5d   :  { %592 = vmatpush.msrb.mxu1 %v2089_v42 }
  0x5e   :  { %635 = vmatpush.msrb.mxu3 %v2168_v61 }
  0x5f   :  { %593 = vmatpush.msrb.mxu1 %v2108_v47 }
  0x60   :  { %1682 = vmatmul.msk.f32.gmra.mxu3 %vm82_vm0, %v2013_v26  ;;  %v2228_v26 = vld [vmem:[#allocation6 + $0x90] sm:$0xff] }
  0x61   :  { %441 = vmatpush.msra.mxu2 %v2228_v26  ;;  %594 = vmatpush.msrb.mxu1 %v2124_v51 }
  0x62   :  { %636 = vmatpush.msrb.mxu3 %v2183_v3 }
  0x63   :  { %595 = vmatpush.msrb.mxu1 %v2163_v59 }
  0x64   :  { %637 = vmatpush.msrb.mxu3 %v2196_v7 }
  0x65   :  { %596 = vmatpush.msrb.mxu1 %v2178_v1 }
  0x66   :  { %638 = vmatpush.msrb.mxu3 %v2208_v10 }
  0x67   :  { %597 = vmatpush.msrb.mxu1 %v2192_v5 }
  0x68   :  { %639 = vmatpush.msrb.mxu3 %v2218_v15 }
  0x69   :  { %598 = vmatpush.msrb.mxu1 %v2204_v8 }
  0x6a   :  { %640 = vmatpush.msrb.mxu3 %v2230_v27 }
  0x6b   :  { %599 = vmatpush.msrb.mxu1 %v2214_v13 }
  0x6d   :  { %600 = vmatpush.msrb.mxu1 %v2226_v18 }
  0x8e   :  { %v124_v62 = vpop.f32.mrf.mxu0 }
  0x8f   :  { %v125_v4 = vadd.f32 %v124_v62, %v2174_v63  ;;  %v2240_v62 = vld [vmem:[#allocation6 + $0x70] sm:$0xff] }
  0x90   :  { %442 = vmatpush.msra.mxu2 %v2240_v62  ;;  %v2265_v28 = vpop.f32.mrf.mxu1 }
  0x91   :  { %v306_v12 = vmul.f32 0.5, %v125_v4  ;;  %v2242_v4 = vld [vmem:[#allocation6 + $0x50] sm:$0xff]  ;;  %2965 = vst [vmem:[#allocation19_spill] sm:$0xff] %v2265_v28 }
  0x92   :  { %443 = vmatpush.msra.mxu2 %v2242_v4 }
  0x93   :  { %v2176_v0 = vpop.f32.mrf.mxu3  ;;  %1695 = vtanh.f32 %v306_v12 }
  0x94   :  { %2962 = vst [vmem:[#allocation16_spill] sm:$0xff] %v2176_v0  ;;  %444 = vmatpush.msra.mxu2 %v2247_v24 }
  0x95   :  { %v206_v22 = vpop.f32.mrf.mxu2 }
  0x96   :  { %v207_v12 = vadd.f32 %v206_v22, %v2235_v29 }
  0x98   :  { %1697 = vtanh.f32 %v207_v12 }
  0x99   :  { %v1696_v0 = vpop.eup %1695 }
  0x9a   :  { %v308_v22 = vadd.f32 1.0, %v1696_v0 }
  0x9b   :  { %v2222_v17 = vpop.f32.mrf.mxu3 }
  0x9c   :  { %2963 = vst [vmem:[#allocation17_spill] sm:$0xff] %v2222_v17  ;;  %v2254_v17 = vld [vmem:[#allocation6 + $0x10] sm:$0xff]  ;;  %v309_v33 = vmul.f32 0.5, %v308_v22 }
  0x9d   :  { %445 = vmatpush.msra.mxu2 %v2254_v17 }
  0x9e   :  { %v1698_v0 = vpop.eup %1697 }
  0x9f   :  { %v2284_v37 = vmul.f32 %v1698_v0, %v309_v33 }
  0xa3   :  { %v2258_v63 = vpop.f32.mrf.mxu3 }
  0xa4   :  { %2964 = vst [vmem:[#allocation18_spill] sm:$0xff] %v2258_v63  ;;  %v165_v63 = vpop.f32.mrf.mxu1 }
  0xab   :  { %v247_v12 = vpop.f32.mrf.mxu3 }
  0xac   :  { %v248_v36 = vadd.f32 %v247_v12, %v2272_v30 }
  0xae   :  { %v312_v22 = vmul.f32 0.5, %v248_v36 }
  0xb0   :  { %1699 = vtanh.f32 %v312_v22 }
  0xb1   :  { %1701 = vtanh.f32 %v2284_v37 }
  0xb6   :  { %v1700_v38 = vpop.eup %1699 }
  0xb7   :  { %v314_v41 = vadd.f32 1.0, %v1700_v38  ;;  %v1702_v44 = vpop.eup %1701 }
  0xb9   :  { %v315_v45 = vmul.f32 0.5, %v314_v41 }
  0xbb   :  { %v2303_v46 = vmul.f32 %v1702_v44, %v315_v45 }
  0xbd   :  { %2966 = vst [vmem:[#allocation20_spill] sm:$0xff] %v2303_v46  ;;  %406 = vmatmul.f32.vlgmr.msrb.gmra.mxu2 %v2303_v46  ;;  %426 = vmatmul.f32.vlgmr.msra.gmra.mxu1 %v2303_v46 }
  0xbe   :  { %466 = vmatmul.f32.vlgmr.msra.gmra.mxu3 %v2303_v46  ;;  %605 = vmatpush.msrb.mxu2 %v2110_v48 }
  0xbf   :  { %760 = vmatpush.msra.mxu1 %v1977_v16  ;;  %800 = vmatpush.msra.mxu3 %v1958_v11  ;;  %v168_v11 = vpop.f32.mrf.mxu1  ;;  %v209_v16 = vpop.f32.mrf.mxu2 }
  0xc0   :  { %606 = vmatpush.msrb.mxu2 %v2122_v50  ;;  %v210_v33 = vadd.f32 %v209_v16, %v2235_v29 }
  0xc1   :  { %761 = vmatpush.msra.mxu1 %v1988_v19  ;;  %801 = vmatpush.msra.mxu3 %v1990_v20  ;;  %v250_v19 = vpop.f32.mrf.mxu3 }
  0xc2   :  { %607 = vmatpush.msrb.mxu2 %v2131_v53 }
  0xc3   :  { %762 = vmatpush.msra.mxu1 %v1999_v23  ;;  %802 = vmatpush.msra.mxu3 %v1994_v21 }
  0xc4   :  { %608 = vmatpush.msrb.mxu2 %v2139_v54 }
  0xc5   :  { %446 = vmatmul.f32.vlgmr.msra.gmra.mxu2 %v2303_v46  ;;  %763 = vmatpush.msra.mxu1 %v2007_v25  ;;  %v2588_v46 = vld [vmem:[#allocation6 + $0x30] sm:$0xff] }
  0xc6   :  { %609 = vmatpush.msrb.mxu2 %v2145_v55  ;;  %803 = vmatpush.msra.mxu3 %v2049_v32  ;;  %2996 = vst [vmem:[#allocation49_spill] sm:$0xff] %v2588_v46 }
  0xc7   :  { %764 = vmatpush.msra.mxu1 %v2045_v31  ;;  %v2376_v20 = vpop.f32.mrf.mxu1  ;;  %v2378_v21 = vpop.f32.mrf.mxu2 }
  0xc8   :  { %610 = vmatpush.msrb.mxu2 %v2154_v57  ;;  %804 = vmatpush.msra.mxu3 %v2057_v35 }
  0xc9   :  { %765 = vmatpush.msra.mxu1 %v2055_v34  ;;  %v2380_v23 = vpop.f32.mrf.mxu3 }
  0xca   :  { %611 = vmatpush.msrb.mxu2 %v2166_v60  ;;  %805 = vmatpush.msra.mxu3 %v2077_v40 }
  0xcb   :  { %766 = vmatpush.msra.mxu1 %v2075_v39 }
  0xcc   :  { %612 = vmatpush.msrb.mxu2 %v2181_v2  ;;  %806 = vmatpush.msra.mxu3 %v2091_v43 }
  0xcd   :  { %767 = vmatpush.msra.mxu1 %v2089_v42 }
  0xce   :  { %613 = vmatpush.msrb.mxu2 %v2194_v6  ;;  %807 = vmatpush.msra.mxu3 %v2117_v49 }
  0xcf   :  { %768 = vmatpush.msra.mxu1 %v2108_v47  ;;  %v2382_v25 = vpop.f32.mrf.mxu1  ;;  %v2384_v31 = vpop.f32.mrf.mxu2 }
  0xd0   :  { %614 = vmatpush.msrb.mxu2 %v2206_v9  ;;  %808 = vmatpush.msra.mxu3 %v2128_v52 }
  0xd1   :  { %769 = vmatpush.msra.mxu1 %v2124_v51  ;;  %v2386_v32 = vpop.f32.mrf.mxu3 }
  0xd2   :  { %615 = vmatpush.msrb.mxu2 %v2216_v14  ;;  %809 = vmatpush.msra.mxu3 %v2152_v56  ;;  %v2409_v56 = vperm.slane %v2160_v58, 1  ;;  %v251_v58 = vadd.f32 %v250_v19, %v2272_v30 }
  0xd3   :  { %770 = vmatpush.msra.mxu1 %v2163_v59 }
  0xd4   :  { %616 = vmatpush.msrb.mxu2 %v2228_v26  ;;  %810 = vmatpush.msra.mxu3 %v2168_v61  ;;  %2977 = vst [vmem:[#allocation31_spill] sm:$0xff] %v2409_v56  ;;  %v169_v61 = vadd.f32 %v168_v11, %v2409_v56 }
  0xd5   :  { %771 = vmatpush.msra.mxu1 %v2178_v1 }
  0xd6   :  { %617 = vmatpush.msrb.mxu2 %v2240_v62  ;;  %811 = vmatpush.msra.mxu3 %v2183_v3  ;;  %v127_v3 = vpop.f32.mrf.mxu0 }
  0xd7   :  { %772 = vmatpush.msra.mxu1 %v2192_v5  ;;  %v2388_v34 = vpop.f32.mrf.mxu1  ;;  %v2390_v35 = vpop.f32.mrf.mxu2 }
  0xd8   :  { %618 = vmatpush.msrb.mxu2 %v2242_v4  ;;  %812 = vmatpush.msra.mxu3 %v2196_v7  ;;  %2967 = vst [vmem:[#allocation21_spill] sm:$0xff] %v2388_v34 }
  0xd9   :  { %773 = vmatpush.msra.mxu1 %v2204_v8  ;;  %2968 = vst [vmem:[#allocation22_spill] sm:$0xff] %v2390_v35  ;;  %v2392_v39 = vpop.f32.mrf.mxu3  ;;  %v2980_v8 = vld [vmem:[#allocation15_spill] sm:$0xff]  ;;  %v2614_v35 = vld [vmem:[#allocation6 + $0x1f0] sm:$0xff] }
  0xda   :  { %619 = vmatpush.msrb.mxu2 %v2247_v24  ;;  %813 = vmatpush.msra.mxu3 %v2208_v10  ;;  %2969 = vst [vmem:[#allocation23_spill] sm:$0xff] %v2392_v39  ;;  %v128_v10 = vadd.f32 %v127_v3, %v2980_v8 }
  0xdb   :  { %774 = vmatpush.msra.mxu1 %v2214_v13 }
  0xdc   :  { %620 = vmatpush.msrb.mxu2 %v2254_v17  ;;  %814 = vmatpush.msra.mxu3 %v2218_v15 }
  0xdd   :  { %775 = vmatpush.msra.mxu1 %v2226_v18 }
  0xde   :  { %780 = vmatpush.msra.mxu2 %v2110_v48  ;;  %815 = vmatpush.msra.mxu3 %v2230_v27 }
  0xdf   :  { %v2394_v40 = vpop.f32.mrf.mxu1  ;;  %v2396_v42 = vpop.f32.mrf.mxu2 }
  0xe0   :  { %781 = vmatpush.msra.mxu2 %v2122_v50  ;;  %2970 = vst [vmem:[#allocation24_spill] sm:$0xff] %v2394_v40  ;;  %v175_v40 = vadd.f32 %v2382_v25, %v2409_v56 }
  0xe1   :  { %2971 = vst [vmem:[#allocation25_spill] sm:$0xff] %v2396_v42  ;;  %v2398_v43 = vpop.f32.mrf.mxu3  ;;  %v2604_v42 = vld [vmem:[#allocation6 + $0x18] sm:$0xff] }
  0xe2   :  { %782 = vmatpush.msra.mxu2 %v2131_v53  ;;  %2972 = vst [vmem:[#allocation26_spill] sm:$0xff] %v2398_v43  ;;  %v2600_v43 = vld [vmem:[#allocation6 + $0x10] sm:$0xff] }
  0xe3   :  { %3000 = vst [vmem:[#allocation53_spill] sm:$0xff] %v2600_v43 }
  0xe4   :  { %783 = vmatpush.msra.mxu2 %v2139_v54  ;;  %3001 = vst [vmem:[#allocation54_spill] sm:$0xff] %v2604_v42 }
  0xe6   :  { %784 = vmatpush.msra.mxu2 %v2145_v55 }
  0xe7   :  { %v2400_v47 = vpop.f32.mrf.mxu1  ;;  %v2402_v49 = vpop.f32.mrf.mxu2 }
  0xe8   :  { %785 = vmatpush.msra.mxu2 %v2154_v57  ;;  %2973 = vst [vmem:[#allocation27_spill] sm:$0xff] %v2400_v47  ;;  %v2598_v47 = vld [vmem:[#allocation6 + $0x8] sm:$0xff] }
  0xe9   :  { %2974 = vst [vmem:[#allocation28_spill] sm:$0xff] %v2402_v49  ;;  %v2404_v51 = vpop.f32.mrf.mxu3  ;;  %v2596_v49 = vld [vmem:[#allocation6] sm:$0xff] }
  0xea   :  { %786 = vmatpush.msra.mxu2 %v2166_v60  ;;  %2975 = vst [vmem:[#allocation29_spill] sm:$0xff] %v2404_v51  ;;  %v2592_v51 = vld [vmem:[#allocation6 + $0x38] sm:$0xff] }
  0xeb   :  { %2997 = vst [vmem:[#allocation50_spill] sm:$0xff] %v2592_v51 }
  0xec   :  { %787 = vmatpush.msra.mxu2 %v2181_v2  ;;  %2998 = vst [vmem:[#allocation51_spill] sm:$0xff] %v2596_v49 }
  0xed   :  { %2999 = vst [vmem:[#allocation52_spill] sm:$0xff] %v2598_v47 }
  0xee   :  { %788 = vmatpush.msra.mxu2 %v2194_v6 }
  0xef   :  { %v2406_v52 = vpop.f32.mrf.mxu1  ;;  %v2411_v59 = vpop.f32.mrf.mxu2 }
  0xf0   :  { %789 = vmatpush.msra.mxu2 %v2206_v9  ;;  %2976 = vst [vmem:[#allocation30_spill] sm:$0xff] %v2406_v52  ;;  %v2579_v52 = vld [vmem:[#allocation6 + $0x58] sm:$0xff] }
  0xf1   :  { %2978 = vst [vmem:[#allocation32_spill] sm:$0xff] %v2411_v59  ;;  %v2414_v63 = vpop.f32.mrf.mxu3  ;;  %v2577_v59 = vld [vmem:[#allocation6 + $0x48] sm:$0xff] }
  0xf2   :  { %790 = vmatpush.msra.mxu2 %v2216_v14  ;;  %2979 = vst [vmem:[#allocation33_spill] sm:$0xff] %v2414_v63  ;;  %v2575_v63 = vld [vmem:[#allocation6 + $0x40] sm:$0xff] }
  0xf3   :  { %2991 = vst [vmem:[#allocation44_spill] sm:$0xff] %v2575_v63 }
  0xf4   :  { %791 = vmatpush.msra.mxu2 %v2228_v26  ;;  %2992 = vst [vmem:[#allocation45_spill] sm:$0xff] %v2577_v59 }
  0xf5   :  { %2993 = vst [vmem:[#allocation46_spill] sm:$0xff] %v2579_v52 }
  0xf6   :  { %792 = vmatpush.msra.mxu2 %v2240_v62 }
  0xf8   :  { %793 = vmatpush.msra.mxu2 %v2242_v4 }
  0xfa   :  { %794 = vmatpush.msra.mxu2 %v2247_v24 }
  0xfc   :  { %795 = vmatpush.msra.mxu2 %v2254_v17 }
 0x13a   :  { %v427_v1 = vpop.f32.mrf.mxu1 }
 0x13b   :  { %v471_v5 = vadd.f32 %v427_v1, %v169_v61 }
 0x13d   :  { %v478_v7 = vmul.f32 0.5, %v471_v5 }
 0x13f   :  { %1703 = vtanh.f32 %v478_v7 }
 0x140   :  { %v407_v13 = vpop.f32.mrf.mxu2 }
 0x141   :  { %v470_v15 = vadd.f32 %v407_v13, %v128_v10  ;;  %v467_v18 = vpop.f32.mrf.mxu3 }
 0x142   :  { %v473_v27 = vadd.f32 %v467_v18, %v251_v58 }
 0x143   :  { %v474_v17 = vmul.f32 0.5, %v470_v15 }
 0x144   :  { %v483_v22 = vmul.f32 0.5, %v473_v27 }
 0x145   :  { %1705 = vtanh.f32 %v474_v17  ;;  %v1704_v24 = vpop.eup %1703 }
 0x146   :  { %v480_v36 = vadd.f32 1.0, %v1704_v24 }
 0x148   :  { %v447_v0 = vpop.f32.mrf.mxu2  ;;  %v481_v44 = vmul.f32 0.5, %v480_v36 }
 0x149   :  { %v472_v12 = vadd.f32 %v447_v0, %v210_v33 }
 0x14a   :  { %v488_v61 = vmul.f32 %v481_v44, %v2284_v37  ;;  %v254_v37 = vadd.f32 %v2380_v23, %v2272_v30 }
 0x14b   :  { %v1706_v38 = vpop.eup %1705  ;;  %1707 = vtanh.f32 %v472_v12 }
 0x14c   :  { %v476_v41 = vadd.f32 1.0, %v1706_v38  ;;  %1709 = vtanh.f32 %v483_v22 }
 0x14e   :  { %v477_v45 = vmul.f32 0.5, %v476_v41 }
 0x151   :  { %v1708_v11 = vpop.eup %1707 }
 0x152   :  { %v489_v1 = vmul.f32 %v1708_v11, %v477_v45  ;;  %v1710_v19 = vpop.eup %1709 }
 0x153   :  { %v485_v5 = vadd.f32 1.0, %v1710_v19  ;;  %v2471_v19 = vld [vmem:[#allocation6 + $0x1d8] sm:$0xff] }
 0x154   :  { %v490_v3 = vadd.f32 %v489_v1, %v488_v61  ;;  %v2467_v61 = vld [vmem:[#allocation6 + $0x1c0] sm:$0xff]  ;;  %v2469_v1 = vld [vmem:[#allocation6 + $0x1c8] sm:$0xff] }
 0x155   :  { %v486_v7 = vmul.f32 0.5, %v485_v5  ;;  %v2478_v5 = vld [vmem:[#allocation6 + $0x1a8] sm:$0xff] }
 0x156   :  { %1711 = vtanh.f32 %v490_v3 }
 0x15c   :  { %v1712_v16 = vpop.eup %1711 }
 0x15d   :  { %v2420_v10 = vmul.f32 %v1712_v16, %v486_v7  ;;  %v2480_v7 = vld [vmem:[#allocation6 + $0x1b8] sm:$0xff]  ;;  %v2485_v16 = vld [vmem:[#allocation6 + $0x180] sm:$0xff] }
 0x15f   :  { %2981 = vst [vmem:[#allocation34_spill] sm:$0xff] %v2420_v10  ;;  %581 = vmatmul.f32.vlgmr.msrb.gmra.mxu0 %v2420_v10  ;;  %601 = vmatmul.f32.vlgmr.msrb.gmra.mxu1 %v2420_v10 }
 0x160   :  { %621 = vmatmul.f32.vlgmr.msrb.gmra.mxu2 %v2420_v10  ;;  %641 = vmatmul.f32.vlgmr.msrb.gmra.mxu3 %v2420_v10  ;;  %v2586_v10 = vld [vmem:[#allocation6 + $0x28] sm:$0xff] }
 0x161   :  { %955 = vmatpush.msrb.mxu2 %v2110_v48  ;;  %v130_v48 = vpop.f32.mrf.mxu0  ;;  %2995 = vst [vmem:[#allocation48_spill] sm:$0xff] %v2586_v10 }
 0x163   :  { %956 = vmatpush.msrb.mxu2 %v2122_v50 }
 0x165   :  { %957 = vmatpush.msrb.mxu2 %v2131_v53  ;;  %v172_v53 = vadd.f32 %v2376_v20, %v2409_v56 }
 0x167   :  { %958 = vmatpush.msrb.mxu2 %v2139_v54  ;;  %v131_v54 = vadd.f32 %v130_v48, %v2980_v8  ;;  %v2487_v48 = vld [vmem:[#allocation6 + $0x188] sm:$0xff] }
 0x169   :  { %959 = vmatpush.msrb.mxu2 %v2145_v55  ;;  %v2440_v50 = vpop.f32.mrf.mxu0  ;;  %v2445_v55 = vld [vmem:[#allocation6 + $0x1e0] sm:$0xff] }
 0x16a   :  { %915 = vmatpush.msrb.mxu0 %v2445_v55  ;;  %v134_v39 = vadd.f32 %v2440_v50, %v2980_v8 }
 0x16b   :  { %960 = vmatpush.msrb.mxu2 %v2154_v57  ;;  %v2447_v57 = vld [vmem:[#allocation6 + $0x1e8] sm:$0xff] }
 0x16c   :  { %935 = vmatpush.msrb.mxu1 %v2447_v57  ;;  %916 = vmatpush.msrb.mxu0 %v2467_v61 }
 0x16d   :  { %961 = vmatpush.msrb.mxu2 %v2166_v60  ;;  %v2449_v60 = vld [vmem:[#allocation6 + $0x1f8] sm:$0xff] }
 0x16e   :  { %975 = vmatpush.msrb.mxu3 %v2449_v60  ;;  %936 = vmatpush.msrb.mxu1 %v2469_v1 }
 0x16f   :  { %962 = vmatpush.msrb.mxu2 %v2181_v2 }
 0x170   :  { %976 = vmatpush.msrb.mxu3 %v2471_v19  ;;  %937 = vmatpush.msrb.mxu1 %v2478_v5 }
 0x171   :  { %963 = vmatpush.msrb.mxu2 %v2194_v6 }
 0x172   :  { %977 = vmatpush.msrb.mxu3 %v2480_v7  ;;  %938 = vmatpush.msrb.mxu1 %v2487_v48 }
 0x173   :  { %964 = vmatpush.msrb.mxu2 %v2206_v9 }
 0x175   :  { %965 = vmatpush.msrb.mxu2 %v2216_v14 }
 0x177   :  { %966 = vmatpush.msrb.mxu2 %v2228_v26 }
 0x179   :  { %967 = vmatpush.msrb.mxu2 %v2240_v62 }
 0x17b   :  { %968 = vmatpush.msrb.mxu2 %v2242_v4  ;;  %v213_v4 = vadd.f32 %v2378_v21, %v2235_v29 }
 0x17d   :  { %969 = vmatpush.msrb.mxu2 %v2588_v46 }
 0x17f   :  { %970 = vmatpush.msrb.mxu2 %v2600_v43 }
 0x1dc   :  { %v582_v2 = vpop.f32.mrf.mxu0  ;;  %v602_v6 = vpop.f32.mrf.mxu1 }
 0x1dd   :  { %v645_v9 = vadd.f32 %v582_v2, %v131_v54  ;;  %v646_v14 = vadd.f32 %v602_v6, %v172_v53  ;;  %v2489_v53 = vld [vmem:[#allocation6 + $0x198] sm:$0xff]  ;;  %v2494_v54 = vld [vmem:[#allocation6 + $0x160] sm:$0xff]  ;;  %v2496_v2 = vld [vmem:[#allocation6 + $0x168] sm:$0xff] }
 0x1de   :  { %978 = vmatpush.msrb.mxu3 %v2489_v53  ;;  %v2498_v6 = vld [vmem:[#allocation6 + $0x178] sm:$0xff]  ;;  %939 = vmatpush.msrb.mxu1 %v2496_v2 }
 0x1df   :  { %v649_v26 = vmul.f32 0.5, %v645_v9  ;;  %v653_v62 = vmul.f32 0.5, %v646_v14  ;;  %v2503_v9 = vld [vmem:[#allocation6 + $0x140] sm:$0xff]  ;;  %v2505_v14 = vld [vmem:[#allocation6 + $0x148] sm:$0xff] }
 0x1e0   :  { %979 = vmatpush.msrb.mxu3 %v2498_v6  ;;  %940 = vmatpush.msrb.mxu1 %v2505_v14 }
 0x1e1   :  { %1713 = vtanh.f32 %v649_v26  ;;  %v2507_v26 = vld [vmem:[#allocation6 + $0x158] sm:$0xff] }
 0x1e2   :  { %1715 = vtanh.f32 %v653_v62  ;;  %980 = vmatpush.msrb.mxu3 %v2507_v26  ;;  %v2512_v62 = vld [vmem:[#allocation6 + $0x120] sm:$0xff] }
 0x1e3   :  { %v622_v20 = vpop.f32.mrf.mxu2  ;;  %v642_v13 = vpop.f32.mrf.mxu3 }
 0x1e4   :  { %v647_v15 = vadd.f32 %v622_v20, %v213_v4  ;;  %v648_v17 = vadd.f32 %v642_v13, %v254_v37  ;;  %v2514_v4 = vld [vmem:[#allocation6 + $0x128] sm:$0xff]  ;;  %v2516_v37 = vld [vmem:[#allocation6 + $0x138] sm:$0xff]  ;;  %v2521_v20 = vld [vmem:[#allocation6 + $0x100] sm:$0xff] }
 0x1e5   :  { %941 = vmatpush.msrb.mxu1 %v2514_v4  ;;  %981 = vmatpush.msrb.mxu3 %v2516_v37  ;;  %v2523_v13 = vld [vmem:[#allocation6 + $0x108] sm:$0xff] }
 0x1e6   :  { %1717 = vtanh.f32 %v647_v15  ;;  %v658_v18 = vmul.f32 0.5, %v648_v17  ;;  %v2525_v15 = vld [vmem:[#allocation6 + $0x118] sm:$0xff]  ;;  %v2530_v17 = vld [vmem:[#allocation6 + $0xe0] sm:$0xff] }
 0x1e7   :  { %v1714_v58 = vpop.eup %1713  ;;  %942 = vmatpush.msrb.mxu1 %v2523_v13  ;;  %982 = vmatpush.msrb.mxu3 %v2525_v15 }
 0x1e8   :  { %v1716_v27 = vpop.eup %1715  ;;  %v651_v24 = vadd.f32 1.0, %v1714_v58  ;;  %1719 = vtanh.f32 %v658_v18  ;;  %v2532_v18 = vld [vmem:[#allocation6 + $0xe8] sm:$0xff]  ;;  %v2534_v58 = vld [vmem:[#allocation6 + $0xf8] sm:$0xff] }
 0x1e9   :  { %v655_v33 = vadd.f32 1.0, %v1716_v27  ;;  %943 = vmatpush.msrb.mxu1 %v2532_v18  ;;  %983 = vmatpush.msrb.mxu3 %v2534_v58  ;;  %v2539_v27 = vld [vmem:[#allocation6 + $0xc0] sm:$0xff] }
 0x1ea   :  { %v652_v0 = vmul.f32 0.5, %v651_v24  ;;  %v2541_v24 = vld [vmem:[#allocation6 + $0xc8] sm:$0xff] }
 0x1eb   :  { %v656_v12 = vmul.f32 0.5, %v655_v33  ;;  %v2543_v33 = vld [vmem:[#allocation6 + $0xd8] sm:$0xff]  ;;  %944 = vmatpush.msrb.mxu1 %v2541_v24 }
 0x1ec   :  { %v1718_v36 = vpop.eup %1717  ;;  %984 = vmatpush.msrb.mxu3 %v2543_v33 }
 0x1ed   :  { %v663_v22 = vmul.f32 %v656_v12, %v490_v3  ;;  %v664_v21 = vmul.f32 %v1718_v36, %v652_v0  ;;  %v2476_v3 = vld [vmem:[#allocation6 + $0x1a0] sm:$0xff]  ;;  %v2550_v12 = vld [vmem:[#allocation6 + $0xa8] sm:$0xff]  ;;  %v2552_v36 = vld [vmem:[#allocation6 + $0xb8] sm:$0xff] }
 0x1ee   :  { %v1720_v38 = vpop.eup %1719  ;;  %917 = vmatpush.msrb.mxu0 %v2476_v3  ;;  %v2548_v0 = vld [vmem:[#allocation6 + $0xa0] sm:$0xff]  ;;  %2983 = vst [vmem:[#allocation36_spill] sm:$0xff] %v2550_v12  ;;  %945 = vmatpush.msrb.mxu1 %v2550_v12 }
 0x1ef   :  { %v2458_v41 = vadd.f32 %v664_v21, %v663_v22  ;;  %v660_v23 = vadd.f32 1.0, %v1720_v38  ;;  %2984 = vst [vmem:[#allocation37_spill] sm:$0xff] %v2552_v36  ;;  %985 = vmatpush.msrb.mxu3 %v2552_v36  ;;  %v2557_v22 = vld [vmem:[#allocation6 + $0x80] sm:$0xff]  ;;  %v2559_v21 = vld [vmem:[#allocation6 + $0x88] sm:$0xff]  ;;  %v2561_v38 = vld [vmem:[#allocation6 + $0x98] sm:$0xff] }
 0x1f0   :  { %918 = vmatpush.msrb.mxu0 %v2485_v16  ;;  %2985 = vst [vmem:[#allocation38_spill] sm:$0xff] %v2557_v22  ;;  %946 = vmatpush.msrb.mxu1 %v2559_v21 }
 0x1f1   :  { %1721 = vtanh.f32 %v2458_v41  ;;  %v661_v44 = vmul.f32 0.5, %v660_v23  ;;  %2986 = vst [vmem:[#allocation39_spill] sm:$0xff] %v2559_v21  ;;  %986 = vmatpush.msrb.mxu3 %v2561_v38  ;;  %v2566_v23 = vld [vmem:[#allocation6 + $0x60] sm:$0xff] }
 0x1f2   :  { %919 = vmatpush.msrb.mxu0 %v2494_v54  ;;  %2987 = vst [vmem:[#allocation40_spill] sm:$0xff] %v2561_v38 }
 0x1f3   :  { %2988 = vst [vmem:[#allocation41_spill] sm:$0xff] %v2566_v23 }
 0x1f4   :  { %920 = vmatpush.msrb.mxu0 %v2503_v9 }
 0x1f6   :  { %921 = vmatpush.msrb.mxu0 %v2512_v62 }
 0x1f7   :  { %v1722_v45 = vpop.eup %1721 }
 0x1f8   :  { %v2461_v11 = vmul.f32 %v1722_v45, %v661_v44  ;;  %922 = vmatpush.msrb.mxu0 %v2521_v20  ;;  %v2568_v44 = vld [vmem:[#allocation6 + $0x68] sm:$0xff]  ;;  %v2570_v45 = vld [vmem:[#allocation6 + $0x78] sm:$0xff] }
 0x1f9   :  { %2989 = vst [vmem:[#allocation42_spill] sm:$0xff] %v2568_v44  ;;  %947 = vmatpush.msrb.mxu1 %v2568_v44  ;;  %987 = vmatpush.msrb.mxu3 %v2570_v45 }
 0x1fa   :  { %2982 = vst [vmem:[#allocation35_spill] sm:$0xff] %v2461_v11  ;;  %756 = vmatmul.f32.vlgmr.msra.gmra.mxu0 %v2461_v11  ;;  %776 = vmatmul.f32.vlgmr.msra.gmra.mxu1 %v2461_v11 }
 0x1fb   :  { %796 = vmatmul.f32.vlgmr.msra.gmra.mxu2 %v2461_v11  ;;  %816 = vmatmul.f32.vlgmr.msra.gmra.mxu3 %v2461_v11  ;;  %2990 = vst [vmem:[#allocation43_spill] sm:$0xff] %v2570_v45  ;;  %v2584_v11 = vld [vmem:[#allocation6 + $0x20] sm:$0xff] }
 0x1fc   :  { %923 = vmatpush.msrb.mxu0 %v2530_v17  ;;  %948 = vmatpush.msrb.mxu1 %v2577_v59  ;;  %2994 = vst [vmem:[#allocation47_spill] sm:$0xff] %v2584_v11 }
 0x1fd   :  { %988 = vmatpush.msrb.mxu3 %v2579_v52  ;;  %1130 = vmatpush.msra.mxu2 %v2614_v35 }
 0x1fe   :  { %924 = vmatpush.msrb.mxu0 %v2539_v27  ;;  %949 = vmatpush.msrb.mxu1 %v2586_v10 }
 0x1ff   :  { %989 = vmatpush.msrb.mxu3 %v2592_v51 }
 0x200   :  { %925 = vmatpush.msrb.mxu0 %v2548_v0  ;;  %950 = vmatpush.msrb.mxu1 %v2598_v47 }
 0x201   :  { %990 = vmatpush.msrb.mxu3 %v2604_v42 }
 0x202   :  { %926 = vmatpush.msrb.mxu0 %v2557_v22  ;;  %1110 = vmatpush.msra.mxu1 %v2447_v57 }
 0x203   :  { %1150 = vmatpush.msra.mxu3 %v2449_v60 }
 0x204   :  { %927 = vmatpush.msrb.mxu0 %v2566_v23  ;;  %1111 = vmatpush.msra.mxu1 %v2469_v1 }
 0x205   :  { %1151 = vmatpush.msra.mxu3 %v2471_v19 }
 0x206   :  { %928 = vmatpush.msrb.mxu0 %v2575_v63  ;;  %1112 = vmatpush.msra.mxu1 %v2478_v5 }
 0x207   :  { %1152 = vmatpush.msra.mxu3 %v2480_v7 }
 0x208   :  { %929 = vmatpush.msrb.mxu0 %v2584_v11  ;;  %1113 = vmatpush.msra.mxu1 %v2487_v48 }
 0x209   :  { %1153 = vmatpush.msra.mxu3 %v2489_v53 }
 0x20a   :  { %930 = vmatpush.msrb.mxu0 %v2596_v49  ;;  %1114 = vmatpush.msra.mxu1 %v2496_v2 }
 0x20b   :  { %1154 = vmatpush.msra.mxu3 %v2498_v6 }
 0x20c   :  { %1090 = vmatpush.msra.mxu0 %v2445_v55  ;;  %1115 = vmatpush.msra.mxu1 %v2505_v14 }
 0x20d   :  { %1155 = vmatpush.msra.mxu3 %v2507_v26 }
 0x20e   :  { %1091 = vmatpush.msra.mxu0 %v2467_v61  ;;  %1116 = vmatpush.msra.mxu1 %v2514_v4 }
 0x20f   :  { %1156 = vmatpush.msra.mxu3 %v2516_v37 }
 0x210   :  { %1092 = vmatpush.msra.mxu0 %v2476_v3  ;;  %1117 = vmatpush.msra.mxu1 %v2523_v13 }
 0x211   :  { %1157 = vmatpush.msra.mxu3 %v2525_v15 }
 0x212   :  { %1093 = vmatpush.msra.mxu0 %v2485_v16  ;;  %1118 = vmatpush.msra.mxu1 %v2532_v18 }
 0x213   :  { %1158 = vmatpush.msra.mxu3 %v2534_v58 }
 0x214   :  { %1094 = vmatpush.msra.mxu0 %v2494_v54  ;;  %1119 = vmatpush.msra.mxu1 %v2541_v24 }
 0x215   :  { %1159 = vmatpush.msra.mxu3 %v2543_v33 }
 0x216   :  { %1095 = vmatpush.msra.mxu0 %v2503_v9  ;;  %1120 = vmatpush.msra.mxu1 %v2550_v12 }
 0x217   :  { %1160 = vmatpush.msra.mxu3 %v2552_v36 }
 0x218   :  { %1096 = vmatpush.msra.mxu0 %v2512_v62  ;;  %1121 = vmatpush.msra.mxu1 %v2559_v21 }
 0x219   :  { %1161 = vmatpush.msra.mxu3 %v2561_v38 }
 0x21a   :  { %1097 = vmatpush.msra.mxu0 %v2521_v20  ;;  %1122 = vmatpush.msra.mxu1 %v2568_v44 }
 0x21b   :  { %1162 = vmatpush.msra.mxu3 %v2570_v45 }
 0x21c   :  { %1098 = vmatpush.msra.mxu0 %v2530_v17  ;;  %1123 = vmatpush.msra.mxu1 %v2577_v59 }
 0x21d   :  { %1163 = vmatpush.msra.mxu3 %v2579_v52 }
 0x21e   :  { %1099 = vmatpush.msra.mxu0 %v2539_v27  ;;  %1124 = vmatpush.msra.mxu1 %v2586_v10 }
 0x21f   :  { %1164 = vmatpush.msra.mxu3 %v2592_v51 }
 0x220   :  { %1100 = vmatpush.msra.mxu0 %v2548_v0  ;;  %1125 = vmatpush.msra.mxu1 %v2598_v47 }
 0x221   :  { %1165 = vmatpush.msra.mxu3 %v2604_v42 }
 0x222   :  { %1101 = vmatpush.msra.mxu0 %v2557_v22 }
 0x224   :  { %1102 = vmatpush.msra.mxu0 %v2566_v23 }
 0x226   :  { %1103 = vmatpush.msra.mxu0 %v2575_v63 }
 0x228   :  { %1104 = vmatpush.msra.mxu0 %v2584_v11 }
 0x22a   :  { %1105 = vmatpush.msra.mxu0 %v2596_v49 }
 0x277   :  { %v757_v34 = vpop.f32.mrf.mxu0  ;;  %v777_v28 = vpop.f32.mrf.mxu1 }
 0x278   :  { %v820_v43 = vadd.f32 %v757_v34, %v134_v39  ;;  %v821_v46 = vadd.f32 %v777_v28, %v175_v40  ;;  %v216_v28 = vadd.f32 %v2384_v31, %v2235_v29  ;;  %v257_v34 = vadd.f32 %v2386_v32, %v2272_v30 }
 0x27a   :  { %v824_v25 = vmul.f32 0.5, %v820_v43  ;;  %v828_v50 = vmul.f32 0.5, %v821_v46 }
 0x27c   :  { %1723 = vtanh.f32 %v824_v25 }
 0x27d   :  { %1725 = vtanh.f32 %v828_v50 }
 0x27e   :  { %v797_v46 = vpop.f32.mrf.mxu2  ;;  %v817_v39 = vpop.f32.mrf.mxu3 }
 0x27f   :  { %v822_v40 = vadd.f32 %v797_v46, %v216_v28  ;;  %v823_v43 = vadd.f32 %v817_v39, %v257_v34 }
 0x281   :  { %1727 = vtanh.f32 %v822_v40  ;;  %v833_v31 = vmul.f32 0.5, %v823_v43 }
 0x282   :  { %v1724_v32 = vpop.eup %1723 }
 0x283   :  { %v1726_v25 = vpop.eup %1725  ;;  %v826_v50 = vadd.f32 1.0, %v1724_v32  ;;  %1729 = vtanh.f32 %v833_v31 }
 0x284   :  { %v830_v28 = vadd.f32 1.0, %v1726_v25 }
 0x285   :  { %v827_v34 = vmul.f32 0.5, %v826_v50 }
 0x286   :  { %v831_v46 = vmul.f32 0.5, %v830_v28 }
 0x287   :  { %v1728_v39 = vpop.eup %1727 }
 0x288   :  { %v838_v40 = vmul.f32 %v831_v46, %v2458_v41  ;;  %v839_v43 = vmul.f32 %v1728_v39, %v827_v34  ;;  %v2725_v34 = vld [vmem:[#allocation6 + $0x1d0] sm:$0xff] }
 0x289   :  { %v1730_v31 = vpop.eup %1729  ;;  %1131 = vmatpush.msra.mxu2 %v2725_v34  ;;  %v2728_v46 = vld [vmem:[#allocation6 + $0x1b0] sm:$0xff] }
 0x28a   :  { %v2650_v32 = vadd.f32 %v839_v43, %v838_v40  ;;  %v835_v41 = vadd.f32 1.0, %v1730_v31  ;;  %v2731_v39 = vld [vmem:[#allocation6 + $0x190] sm:$0xff] }
 0x28b   :  { %1132 = vmatpush.msra.mxu2 %v2728_v46  ;;  %v2734_v40 = vld [vmem:[#allocation6 + $0x170] sm:$0xff] }
 0x28c   :  { %1731 = vtanh.f32 %v2650_v32  ;;  %v836_v25 = vmul.f32 0.5, %v835_v41  ;;  %v2737_v43 = vld [vmem:[#allocation6 + $0x150] sm:$0xff] }
 0x28d   :  { %1133 = vmatpush.msra.mxu2 %v2731_v39  ;;  %v2740_v31 = vld [vmem:[#allocation6 + $0x130] sm:$0xff] }
 0x28e   :  { %v2743_v41 = vld [vmem:[#allocation6 + $0x110] sm:$0xff] }
 0x28f   :  { %1134 = vmatpush.msra.mxu2 %v2734_v40 }
 0x291   :  { %1135 = vmatpush.msra.mxu2 %v2737_v43 }
 0x292   :  { %v1732_v50 = vpop.eup %1731 }
 0x293   :  { %v2667_v28 = vmul.f32 %v1732_v50, %v836_v25  ;;  %1136 = vmatpush.msra.mxu2 %v2740_v31  ;;  %v2746_v25 = vld [vmem:[#allocation6 + $0xf0] sm:$0xff] }
 0x294   :  { %v2749_v50 = vld [vmem:[#allocation6 + $0xd0] sm:$0xff] }
 0x295   :  { %3002 = vst [vmem:[#allocation55_spill] sm:$0xff] %v2667_v28  ;;  %931 = vmatmul.f32.vlgmr.msrb.gmra.mxu0 %v2667_v28  ;;  %951 = vmatmul.f32.vlgmr.msrb.gmra.mxu1 %v2667_v28 }
 0x296   :  { %971 = vmatmul.f32.vlgmr.msrb.gmra.mxu2 %v2667_v28  ;;  %991 = vmatmul.f32.vlgmr.msrb.gmra.mxu3 %v2667_v28  ;;  %v2752_v28 = vld [vmem:[#allocation6 + $0xb0] sm:$0xff] }
 0x297   :  { %1265 = vmatpush.msrb.mxu0 %v2445_v55  ;;  %1285 = vmatpush.msrb.mxu1 %v2447_v57 }
 0x298   :  { %1325 = vmatpush.msrb.mxu3 %v2449_v60  ;;  %1137 = vmatpush.msra.mxu2 %v2743_v41 }
 0x299   :  { %1266 = vmatpush.msrb.mxu0 %v2467_v61  ;;  %1286 = vmatpush.msrb.mxu1 %v2469_v1 }
 0x29a   :  { %1326 = vmatpush.msrb.mxu3 %v2471_v19  ;;  %1138 = vmatpush.msra.mxu2 %v2746_v25 }
 0x29b   :  { %1267 = vmatpush.msrb.mxu0 %v2476_v3  ;;  %1287 = vmatpush.msrb.mxu1 %v2478_v5 }
 0x29c   :  { %1327 = vmatpush.msrb.mxu3 %v2480_v7  ;;  %1139 = vmatpush.msra.mxu2 %v2749_v50 }
 0x29d   :  { %1268 = vmatpush.msrb.mxu0 %v2485_v16  ;;  %1288 = vmatpush.msrb.mxu1 %v2487_v48 }
 0x29e   :  { %1328 = vmatpush.msrb.mxu3 %v2489_v53  ;;  %1140 = vmatpush.msra.mxu2 %v2752_v28 }
 0x29f   :  { %1269 = vmatpush.msrb.mxu0 %v2494_v54  ;;  %1289 = vmatpush.msrb.mxu1 %v2496_v2 }
 0x2a0   :  { %1329 = vmatpush.msrb.mxu3 %v2498_v6 }
 0x2a1   :  { %1270 = vmatpush.msrb.mxu0 %v2503_v9  ;;  %1290 = vmatpush.msrb.mxu1 %v2505_v14 }
 0x2a2   :  { %1330 = vmatpush.msrb.mxu3 %v2507_v26 }
 0x2a3   :  { %1271 = vmatpush.msrb.mxu0 %v2512_v62  ;;  %1291 = vmatpush.msrb.mxu1 %v2514_v4 }
 0x2a4   :  { %1331 = vmatpush.msrb.mxu3 %v2516_v37 }
 0x2a5   :  { %1272 = vmatpush.msrb.mxu0 %v2521_v20  ;;  %1292 = vmatpush.msrb.mxu1 %v2523_v13 }
 0x2a6   :  { %1332 = vmatpush.msrb.mxu3 %v2525_v15 }
 0x2a7   :  { %1273 = vmatpush.msrb.mxu0 %v2530_v17  ;;  %1293 = vmatpush.msrb.mxu1 %v2532_v18 }
 0x2a8   :  { %1333 = vmatpush.msrb.mxu3 %v2534_v58 }
 0x2a9   :  { %1274 = vmatpush.msrb.mxu0 %v2539_v27  ;;  %1294 = vmatpush.msrb.mxu1 %v2541_v24 }
 0x2aa   :  { %1334 = vmatpush.msrb.mxu3 %v2543_v33 }
 0x2ab   :  { %1275 = vmatpush.msrb.mxu0 %v2548_v0  ;;  %1295 = vmatpush.msrb.mxu1 %v2550_v12 }
 0x2ac   :  { %1335 = vmatpush.msrb.mxu3 %v2552_v36  ;;  %v3007_v36 = vld [vmem:[#allocation22_spill] sm:$0xff] }
 0x2ad   :  { %1276 = vmatpush.msrb.mxu0 %v2557_v22  ;;  %1296 = vmatpush.msrb.mxu1 %v2559_v21  ;;  %v219_v12 = vadd.f32 %v3007_v36, %v2235_v29 }
 0x2ae   :  { %1336 = vmatpush.msrb.mxu3 %v2561_v38 }
 0x2af   :  { %1277 = vmatpush.msrb.mxu0 %v2566_v23  ;;  %1297 = vmatpush.msrb.mxu1 %v2568_v44 }
 0x2b0   :  { %1337 = vmatpush.msrb.mxu3 %v2570_v45 }
 0x2b1   :  { %1278 = vmatpush.msrb.mxu0 %v2575_v63  ;;  %1298 = vmatpush.msrb.mxu1 %v2577_v59  ;;  %v3006_v59 = vld [vmem:[#allocation21_spill] sm:$0xff] }
 0x2b2   :  { %1338 = vmatpush.msrb.mxu3 %v2579_v52  ;;  %v178_v63 = vadd.f32 %v3006_v59, %v2409_v56 }
 0x2b3   :  { %1279 = vmatpush.msrb.mxu0 %v2584_v11  ;;  %1299 = vmatpush.msrb.mxu1 %v2586_v10  ;;  %v3004_v10 = vld [vmem:[#allocation53_spill] sm:$0xff]  ;;  %v3005_v11 = vld [vmem:[#allocation19_spill] sm:$0xff] }
 0x2b4   :  { %1339 = vmatpush.msrb.mxu3 %v2592_v51  ;;  %v3003_v51 = vld [vmem:[#allocation49_spill] sm:$0xff]  ;;  %v137_v52 = vadd.f32 %v3005_v11, %v2980_v8  ;;  %v3008_v11 = vld [vmem:[#allocation23_spill] sm:$0xff] }
 0x2b5   :  { %1280 = vmatpush.msrb.mxu0 %v2596_v49  ;;  %1300 = vmatpush.msrb.mxu1 %v2598_v47  ;;  %v2758_v47 = vld [vmem:[#allocation6 + $0x70] sm:$0xff]  ;;  %v260_v8 = vadd.f32 %v3008_v11, %v2272_v30 }
 0x2b6   :  { %1340 = vmatpush.msrb.mxu3 %v2604_v42  ;;  %v2755_v42 = vld [vmem:[#allocation6 + $0x90] sm:$0xff] }
 0x2b7   :  { %1141 = vmatpush.msra.mxu2 %v2755_v42  ;;  %v2761_v49 = vld [vmem:[#allocation6 + $0x50] sm:$0xff] }
 0x2b9   :  { %1142 = vmatpush.msra.mxu2 %v2758_v47 }
 0x2bb   :  { %1143 = vmatpush.msra.mxu2 %v2761_v49 }
 0x2bd   :  { %1144 = vmatpush.msra.mxu2 %v3003_v51 }
 0x2bf   :  { %1145 = vmatpush.msra.mxu2 %v3004_v10 }
 0x2c1   :  { %1305 = vmatpush.msrb.mxu2 %v2614_v35 }
 0x2c3   :  { %1306 = vmatpush.msrb.mxu2 %v2725_v34 }
 0x2c5   :  { %1307 = vmatpush.msrb.mxu2 %v2728_v46 }
 0x2c7   :  { %1308 = vmatpush.msrb.mxu2 %v2731_v39 }
 0x2c9   :  { %1309 = vmatpush.msrb.mxu2 %v2734_v40 }
 0x2cb   :  { %1310 = vmatpush.msrb.mxu2 %v2737_v43 }
 0x2cd   :  { %1311 = vmatpush.msrb.mxu2 %v2740_v31 }
 0x2cf   :  { %1312 = vmatpush.msrb.mxu2 %v2743_v41 }
 0x2d1   :  { %1313 = vmatpush.msrb.mxu2 %v2746_v25 }
 0x2d3   :  { %1314 = vmatpush.msrb.mxu2 %v2749_v50 }
 0x2d5   :  { %1315 = vmatpush.msrb.mxu2 %v2752_v28 }
 0x2d7   :  { %1316 = vmatpush.msrb.mxu2 %v2755_v42 }
 0x2d9   :  { %1317 = vmatpush.msrb.mxu2 %v2758_v47 }
 0x2db   :  { %1318 = vmatpush.msrb.mxu2 %v2761_v49 }
 0x2dd   :  { %1319 = vmatpush.msrb.mxu2 %v3003_v51 }
 0x2df   :  { %1320 = vmatpush.msrb.mxu2 %v3004_v10 }
 0x312   :  { %v932_v45 = vpop.f32.mrf.mxu0  ;;  %v952_v44 = vpop.f32.mrf.mxu1 }
 0x313   :  { %v995_v23 = vadd.f32 %v932_v45, %v137_v52  ;;  %v996_v38 = vadd.f32 %v952_v44, %v178_v63 }
 0x315   :  { %v999_v21 = vmul.f32 0.5, %v995_v23  ;;  %v1003_v22 = vmul.f32 0.5, %v996_v38 }
 0x317   :  { %1733 = vtanh.f32 %v999_v21 }
 0x318   :  { %1735 = vtanh.f32 %v1003_v22 }
 0x319   :  { %v972_v59 = vpop.f32.mrf.mxu2  ;;  %v992_v56 = vpop.f32.mrf.mxu3 }
 0x31a   :  { %v997_v52 = vadd.f32 %v972_v59, %v219_v12  ;;  %v998_v63 = vadd.f32 %v992_v56, %v260_v8 }
 0x31c   :  { %1737 = vtanh.f32 %v997_v52  ;;  %v1008_v38 = vmul.f32 0.5, %v998_v63 }
 0x31d   :  { %v1734_v21 = vpop.eup %1733 }
 0x31e   :  { %v1736_v23 = vpop.eup %1735  ;;  %v1001_v44 = vadd.f32 1.0, %v1734_v21  ;;  %1739 = vtanh.f32 %v1008_v38 }
 0x31f   :  { %v1005_v36 = vadd.f32 1.0, %v1736_v23 }
 0x320   :  { %v1002_v22 = vmul.f32 0.5, %v1001_v44 }
 0x321   :  { %v1006_v45 = vmul.f32 0.5, %v1005_v36 }
 0x322   :  { %v1738_v11 = vpop.eup %1737 }
 0x323   :  { %v1013_v56 = vmul.f32 %v1006_v45, %v2650_v32  ;;  %v1014_v8 = vmul.f32 %v1738_v11, %v1002_v22  ;;  %v1569_v11 = vld [vmem:[#allocation9 + $0x78] sm:$0xff] }
 0x324   :  { %v1740_v12 = vpop.eup %1739 }
 0x325   :  { %v2786_v59 = vadd.f32 %v1014_v8, %v1013_v56  ;;  %v1010_v52 = vadd.f32 1.0, %v1740_v12  ;;  %v1568_v56 = vld [vmem:[#allocation9 + $0x70] sm:$0xff]  ;;  %v1567_v8 = vld [vmem:[#allocation9 + $0x68] sm:$0xff]  ;;  %v1566_v12 = vld [vmem:[#allocation9 + $0x60] sm:$0xff] }
 0x327   :  { %1741 = vtanh.f32 %v2786_v59  ;;  %v1011_v63 = vmul.f32 0.5, %v1010_v52  ;;  %v1564_v52 = vld [vmem:[#allocation9 + $0x50] sm:$0xff] }
 0x32d   :  { %v1742_v38 = vpop.eup %1741 }
 0x32e   :  { %v2793_v32 = vmul.f32 %v1742_v38, %v1011_v63  ;;  %v1563_v63 = vld [vmem:[#allocation9 + $0x48] sm:$0xff]  ;;  %v1562_v38 = vld [vmem:[#allocation9 + $0x40] sm:$0xff] }
 0x330   :  { %1106 = vmatmul.f32.vlgmr.msra.gmra.mxu0 %v2793_v32  ;;  %1126 = vmatmul.f32.vlgmr.msra.gmra.mxu1 %v2793_v32 }
 0x331   :  { %1146 = vmatmul.f32.vlgmr.msra.gmra.mxu2 %v2793_v32  ;;  %1166 = vmatmul.f32.vlgmr.msra.gmra.mxu3 %v2793_v32 }
 0x332   :  { %1440 = vmatpush.msra.mxu0 %v2445_v55  ;;  %1460 = vmatpush.msra.mxu1 %v2447_v57  ;;  %v3010_v55 = vld [vmem:[#allocation37_spill] sm:$0xff]  ;;  %v3011_v57 = vld [vmem:[#allocation38_spill] sm:$0xff] }
 0x333   :  { %1480 = vmatpush.msra.mxu2 %v2614_v35  ;;  %1500 = vmatpush.msra.mxu3 %v2449_v60  ;;  %v3009_v35 = vld [vmem:[#allocation36_spill] sm:$0xff]  ;;  %v3012_v60 = vld [vmem:[#allocation39_spill] sm:$0xff] }
 0x334   :  { %1441 = vmatpush.msra.mxu0 %v2467_v61  ;;  %1461 = vmatpush.msra.mxu1 %v2469_v1  ;;  %v3013_v61 = vld [vmem:[#allocation40_spill] sm:$0xff]  ;;  %v3014_v1 = vld [vmem:[#allocation41_spill] sm:$0xff] }
 0x335   :  { %1481 = vmatpush.msra.mxu2 %v2725_v34  ;;  %1501 = vmatpush.msra.mxu3 %v2471_v19  ;;  %v3015_v19 = vld [vmem:[#allocation42_spill] sm:$0xff] }
 0x336   :  { %1442 = vmatpush.msra.mxu0 %v2476_v3  ;;  %1462 = vmatpush.msra.mxu1 %v2478_v5  ;;  %v3016_v3 = vld [vmem:[#allocation43_spill] sm:$0xff]  ;;  %v3017_v5 = vld [vmem:[#allocation44_spill] sm:$0xff] }
 0x337   :  { %1482 = vmatpush.msra.mxu2 %v2728_v46  ;;  %1502 = vmatpush.msra.mxu3 %v2480_v7  ;;  %v3018_v7 = vld [vmem:[#allocation45_spill] sm:$0xff] }
 0x338   :  { %1443 = vmatpush.msra.mxu0 %v2485_v16  ;;  %1463 = vmatpush.msra.mxu1 %v2487_v48  ;;  %v3019_v16 = vld [vmem:[#allocation46_spill] sm:$0xff]  ;;  %v3020_v48 = vld [vmem:[#allocation47_spill] sm:$0xff] }
 0x339   :  { %1483 = vmatpush.msra.mxu2 %v2731_v39  ;;  %1503 = vmatpush.msra.mxu3 %v2489_v53  ;;  %v3022_v53 = vld [vmem:[#allocation50_spill] sm:$0xff] }
 0x33a   :  { %1444 = vmatpush.msra.mxu0 %v2494_v54  ;;  %1464 = vmatpush.msra.mxu1 %v2496_v2  ;;  %v3023_v54 = vld [vmem:[#allocation51_spill] sm:$0xff]  ;;  %v3025_v2 = vld [vmem:[#allocation54_spill] sm:$0xff] }
 0x33b   :  { %1484 = vmatpush.msra.mxu2 %v2734_v40  ;;  %1504 = vmatpush.msra.mxu3 %v2498_v6  ;;  %v3026_v6 = vld [vmem:[#allocation15_spill] sm:$0xff] }
 0x33c   :  { %1445 = vmatpush.msra.mxu0 %v2503_v9  ;;  %1465 = vmatpush.msra.mxu1 %v2505_v14  ;;  %v3028_v14 = vld [vmem:[#allocation31_spill] sm:$0xff] }
 0x33d   :  { %1485 = vmatpush.msra.mxu2 %v2737_v43  ;;  %1505 = vmatpush.msra.mxu3 %v2507_v26  ;;  %v3029_v26 = vld [vmem:[#allocation24_spill] sm:$0xff] }
 0x33e   :  { %1446 = vmatpush.msra.mxu0 %v2512_v62  ;;  %1466 = vmatpush.msra.mxu1 %v2514_v4  ;;  %v181_v62 = vadd.f32 %v3029_v26, %v3028_v14 }
 0x33f   :  { %1486 = vmatpush.msra.mxu2 %v2740_v31  ;;  %1506 = vmatpush.msra.mxu3 %v2516_v37 }
 0x340   :  { %1447 = vmatpush.msra.mxu0 %v2521_v20  ;;  %1467 = vmatpush.msra.mxu1 %v2523_v13 }
 0x341   :  { %1487 = vmatpush.msra.mxu2 %v2743_v41  ;;  %1507 = vmatpush.msra.mxu3 %v2525_v15 }
 0x342   :  { %1448 = vmatpush.msra.mxu0 %v2530_v17  ;;  %1468 = vmatpush.msra.mxu1 %v2532_v18  ;;  %v3030_v17 = vld [vmem:[#allocation25_spill] sm:$0xff] }
 0x343   :  { %1488 = vmatpush.msra.mxu2 %v2746_v25  ;;  %1508 = vmatpush.msra.mxu3 %v2534_v58  ;;  %v222_v18 = vadd.f32 %v3030_v17, %v2235_v29 }
 0x344   :  { %1449 = vmatpush.msra.mxu0 %v2539_v27  ;;  %1469 = vmatpush.msra.mxu1 %v2541_v24 }
 0x345   :  { %1489 = vmatpush.msra.mxu2 %v2749_v50  ;;  %1509 = vmatpush.msra.mxu3 %v2543_v33 }
 0x346   :  { %1450 = vmatpush.msra.mxu0 %v2548_v0  ;;  %1470 = vmatpush.msra.mxu1 %v3009_v35  ;;  %v1561_v35 = vld [vmem:[#allocation9 + $0x38] sm:$0xff] }
 0x347   :  { %1490 = vmatpush.msra.mxu2 %v2752_v28  ;;  %1510 = vmatpush.msra.mxu3 %v3010_v55  ;;  %v1560_v55 = vld [vmem:[#allocation9 + $0x30] sm:$0xff] }
 0x348   :  { %1451 = vmatpush.msra.mxu0 %v3011_v57  ;;  %1471 = vmatpush.msra.mxu1 %v3012_v60  ;;  %v1559_v57 = vld [vmem:[#allocation9 + $0x28] sm:$0xff]  ;;  %v1558_v60 = vld [vmem:[#allocation9 + $0x20] sm:$0xff] }
 0x349   :  { %1491 = vmatpush.msra.mxu2 %v2755_v42  ;;  %1511 = vmatpush.msra.mxu3 %v3013_v61  ;;  %v3021_v42 = vld [vmem:[#allocation48_spill] sm:$0xff]  ;;  %v3032_v61 = vld [vmem:[#allocation17_spill] sm:$0xff] }
 0x34a   :  { %1452 = vmatpush.msra.mxu0 %v3014_v1  ;;  %1472 = vmatpush.msra.mxu1 %v3015_v19  ;;  %v143_v1 = vadd.f32 %v3032_v61, %v3026_v6  ;;  %v3033_v19 = vld [vmem:[#allocation27_spill] sm:$0xff] }
 0x34b   :  { %1492 = vmatpush.msra.mxu2 %v2758_v47  ;;  %1512 = vmatpush.msra.mxu3 %v3016_v3  ;;  %v3024_v47 = vld [vmem:[#allocation52_spill] sm:$0xff]  ;;  %v184_v3 = vadd.f32 %v3033_v19, %v3028_v14 }
 0x34c   :  { %1453 = vmatpush.msra.mxu0 %v3017_v5  ;;  %1473 = vmatpush.msra.mxu1 %v3018_v7  ;;  %v1557_v5 = vld [vmem:[#allocation9 + $0x18] sm:$0xff]  ;;  %v1556_v7 = vld [vmem:[#allocation9 + $0x10] sm:$0xff] }
 0x34d   :  { %1493 = vmatpush.msra.mxu2 %v2761_v49  ;;  %1513 = vmatpush.msra.mxu3 %v3019_v16  ;;  %v3027_v49 = vld [vmem:[#allocation16_spill] sm:$0xff] }
 0x34e   :  { %1454 = vmatpush.msra.mxu0 %v3020_v48  ;;  %1474 = vmatpush.msra.mxu1 %v3021_v42  ;;  %v140_v9 = vadd.f32 %v3027_v49, %v3026_v6  ;;  %v1554_v49 = vld [vmem:[#allocation9] sm:$0xff] }
 0x34f   :  { %1494 = vmatpush.msra.mxu2 %v3003_v51  ;;  %1514 = vmatpush.msra.mxu3 %v3022_v53 }
 0x350   :  { %1455 = vmatpush.msra.mxu0 %v3023_v54  ;;  %1475 = vmatpush.msra.mxu1 %v3024_v47  ;;  %v1555_v54 = vld [vmem:[#allocation9 + $0x8] sm:$0xff] }
 0x351   :  { %1495 = vmatpush.msra.mxu2 %v3004_v10  ;;  %1515 = vmatpush.msra.mxu3 %v3025_v2  ;;  %v3031_v10 = vld [vmem:[#allocation26_spill] sm:$0xff] }
 0x352   :  { %v263_v58 = vadd.f32 %v3031_v10, %v2272_v30 }
 0x3ad   :  { %v1107_v4 = vpop.f32.mrf.mxu0  ;;  %v1127_v37 = vpop.f32.mrf.mxu1 }
 0x3ae   :  { %v1170_v20 = vadd.f32 %v1107_v4, %v140_v9  ;;  %v1171_v51 = vadd.f32 %v1127_v37, %v181_v62  ;;  %v3034_v9 = vld [vmem:[#allocation28_spill] sm:$0xff]  ;;  %v3035_v62 = vld [vmem:[#allocation29_spill] sm:$0xff] }
 0x3af   :  { %v225_v26 = vadd.f32 %v3034_v9, %v2235_v29  ;;  %v266_v4 = vadd.f32 %v3035_v62, %v2272_v30 }
 0x3b0   :  { %v1174_v13 = vmul.f32 0.5, %v1170_v20  ;;  %v1178_v15 = vmul.f32 0.5, %v1171_v51 }
 0x3b2   :  { %1743 = vtanh.f32 %v1174_v13 }
 0x3b3   :  { %1745 = vtanh.f32 %v1178_v15 }
 0x3b4   :  { %v1147_v27 = vpop.f32.mrf.mxu2  ;;  %v1167_v24 = vpop.f32.mrf.mxu3 }
 0x3b5   :  { %v1172_v33 = vadd.f32 %v1147_v27, %v222_v18  ;;  %v1173_v0 = vadd.f32 %v1167_v24, %v263_v58 }
 0x3b7   :  { %1747 = vtanh.f32 %v1172_v33  ;;  %v1183_v28 = vmul.f32 0.5, %v1173_v0 }
 0x3b8   :  { %v1744_v34 = vpop.eup %1743 }
 0x3b9   :  { %v1746_v46 = vpop.eup %1745  ;;  %v1176_v39 = vadd.f32 1.0, %v1744_v34  ;;  %1749 = vtanh.f32 %v1183_v28 }
 0x3ba   :  { %v1180_v40 = vadd.f32 1.0, %v1746_v46 }
 0x3bb   :  { %v1177_v43 = vmul.f32 0.5, %v1176_v39 }
 0x3bc   :  { %v1181_v31 = vmul.f32 0.5, %v1180_v40 }
 0x3bd   :  { %v1748_v41 = vpop.eup %1747 }
 0x3be   :  { %v1188_v25 = vmul.f32 %v1181_v31, %v2786_v59  ;;  %v1189_v50 = vmul.f32 %v1748_v41, %v1177_v43  ;;  %v1565_v59 = vld [vmem:[#allocation9 + $0x58] sm:$0xff]  ;;  %v3036_v41 = vld [vmem:[#allocation20_spill] sm:$0xff] }
 0x3bf   :  { %v1750_v21 = vpop.eup %1749 }
 0x3c0   :  { %v2873_v23 = vadd.f32 %v1189_v50, %v1188_v25  ;;  %v1185_v44 = vadd.f32 1.0, %v1750_v21  ;;  %v3037_v25 = vld [vmem:[#allocation34_spill] sm:$0xff]  ;;  %v3038_v50 = vld [vmem:[#allocation35_spill] sm:$0xff] }
 0x3c1   :  { %v3039_v21 = vld [vmem:[#allocation55_spill] sm:$0xff] }
 0x3c2   :  { %1751 = vtanh.f32 %v2873_v23  ;;  %v1186_v36 = vmul.f32 0.5, %v1185_v44 }
 0x3c8   :  { %v1752_v22 = vpop.eup %1751 }
 0x3c9   :  { %v2876_v45 = vmul.f32 %v1752_v22, %v1186_v36  ;;  %v3041_v36 = vld [vmem:[#allocation30_spill] sm:$0xff] }
 0x3ca   :  { %v187_v22 = vadd.f32 %v3041_v36, %v3028_v14 }
 0x3cb   :  { %1281 = vmatmul.f32.vlgmr.msrb.gmra.mxu0 %v2876_v45  ;;  %1301 = vmatmul.f32.vlgmr.msrb.gmra.mxu1 %v2876_v45 }
 0x3cc   :  { %1321 = vmatmul.f32.vlgmr.msrb.gmra.mxu2 %v2876_v45  ;;  %1341 = vmatmul.f32.vlgmr.msrb.gmra.mxu3 %v2876_v45 }
 0x3cd   :  { %1574 = vmatpush.msrb.mxu0 %v1569_v11 }
 0x3cf   :  { %1575 = vmatpush.msrb.mxu0 %v1568_v56 }
 0x3d1   :  { %1576 = vmatpush.msrb.mxu0 %v1567_v8 }
 0x3d3   :  { %1577 = vmatpush.msrb.mxu0 %v1566_v12 }
 0x3d5   :  { %1578 = vmatpush.msrb.mxu0 %v1565_v59 }
 0x3d7   :  { %1579 = vmatpush.msrb.mxu0 %v1564_v52 }
 0x3d9   :  { %1580 = vmatpush.msrb.mxu0 %v1563_v63 }
 0x3db   :  { %1581 = vmatpush.msrb.mxu0 %v1562_v38 }
 0x3dd   :  { %1582 = vmatpush.msrb.mxu0 %v1561_v35 }
 0x3df   :  { %1583 = vmatpush.msrb.mxu0 %v1560_v55 }
 0x3e1   :  { %1584 = vmatpush.msrb.mxu0 %v1559_v57 }
 0x3e3   :  { %1585 = vmatpush.msrb.mxu0 %v1558_v60 }
 0x3e5   :  { %1586 = vmatpush.msrb.mxu0 %v1557_v5 }
 0x3e7   :  { %1587 = vmatpush.msrb.mxu0 %v1556_v7 }
 0x3e9   :  { %1588 = vmatpush.msrb.mxu0 %v1555_v54 }
 0x3eb   :  { %1589 = vmatpush.msrb.mxu0 %v1554_v49 }
 0x448   :  { %v1282_v16 = vpop.f32.mrf.mxu0  ;;  %v1302_v48 = vpop.f32.mrf.mxu1 }
 0x449   :  { %v1345_v42 = vadd.f32 %v1282_v16, %v143_v1  ;;  %v1346_v53 = vadd.f32 %v1302_v48, %v184_v3 }
 0x44b   :  { %v1349_v47 = vmul.f32 0.5, %v1345_v42  ;;  %v1353_v2 = vmul.f32 0.5, %v1346_v53 }
 0x44d   :  { %1753 = vtanh.f32 %v1349_v47 }
 0x44e   :  { %1755 = vtanh.f32 %v1353_v2 }
 0x44f   :  { %v1322_v37 = vpop.f32.mrf.mxu2  ;;  %v1342_v20 = vpop.f32.mrf.mxu3 }
 0x450   :  { %v1347_v51 = vadd.f32 %v1322_v37, %v225_v26  ;;  %v1348_v13 = vadd.f32 %v1342_v20, %v266_v4 }
 0x452   :  { %1757 = vtanh.f32 %v1347_v51  ;;  %v1358_v15 = vmul.f32 0.5, %v1348_v13 }
 0x453   :  { %v1754_v17 = vpop.eup %1753 }
 0x454   :  { %v1756_v18 = vpop.eup %1755  ;;  %v1351_v10 = vadd.f32 1.0, %v1754_v17  ;;  %1759 = vtanh.f32 %v1358_v15 }
 0x455   :  { %v1355_v58 = vadd.f32 1.0, %v1756_v18 }
 0x456   :  { %v1352_v27 = vmul.f32 0.5, %v1351_v10 }
 0x457   :  { %v1356_v24 = vmul.f32 0.5, %v1355_v58 }
 0x458   :  { %v1758_v33 = vpop.eup %1757 }
 0x459   :  { %v1363_v0 = vmul.f32 %v1356_v24, %v2873_v23  ;;  %v1364_v28 = vmul.f32 %v1758_v33, %v1352_v27  ;;  %v3040_v23 = vld [vmem:[#allocation18_spill] sm:$0xff] }
 0x45a   :  { %v1760_v34 = vpop.eup %1759  ;;  %v146_v44 = vadd.f32 %v3040_v23, %v3026_v6  ;;  %v3043_v6 = vld [vmem:[#allocation33_spill] sm:$0xff] }
 0x45b   :  { %v1365_v46 = vadd.f32 %v1364_v28, %v1363_v0  ;;  %v1360_v39 = vadd.f32 1.0, %v1760_v34  ;;  %v269_v38 = vadd.f32 %v3043_v6, %v2272_v30 }
 0x45d   :  { %1761 = vtanh.f32 %v1365_v46  ;;  %v1361_v40 = vmul.f32 0.5, %v1360_v39 }
 0x463   :  { %v1762_v43 = vpop.eup %1761 }
 0x464   :  { %v1367_v31 = vmul.f32 %v1762_v43, %v1361_v40 }
 0x466   :  { %1456 = vmatmul.f32.vlgmr.msra.gmra.mxu0 %v1367_v31  ;;  %1476 = vmatmul.f32.vlgmr.msra.gmra.mxu1 %v1367_v31 }
 0x467   :  { %1496 = vmatmul.f32.vlgmr.msra.gmra.mxu2 %v1367_v31  ;;  %1516 = vmatmul.f32.vlgmr.msra.gmra.mxu3 %v1367_v31 }
 0x46e   :  { %1590 = vmatmul.f32.vlgmr.msrb.gmra.mxu0 %v3036_v41 }
 0x476   :  { %1593 = vmatmul.f32.gmra.mxu0 %v3037_v25 }
 0x47e   :  { %1596 = vmatmul.f32.gmra.mxu0 %v3038_v50 }
 0x486   :  { %1599 = vmatmul.f32.gmra.mxu0 %v3039_v21 }
 0x48e   :  { %1602 = vmatmul.f32.gmra.mxu0 %v2793_v32  ;;  %v2904_v32 = vld [vmem:[%s2929_s5] ss:$0 sm:$0xff]  ;;  %s1873_s5 = smov [#allocation11]  }
 0x48f   :  { %s1635_s18 = sshll.u32 %s1873_s5, 4  ;;  %s1636_s18 = int_to_ptr.vmem [resolvable:$true] %s1635_s18 }
 0x496   :  { %1605 = vmatmul.f32.gmra.mxu0 %v2876_v45  ;;  %v3042_v45 = vld [vmem:[#allocation32_spill] sm:$0xff] }
 0x497   :  { %v228_v63 = vadd.f32 %v3042_v45, %v2235_v29 }
 0x49e   :  { %1608 = vmatmul.f32.gmra.mxu0 %v1367_v31 }
 0x4e3   :  { %v1457_v11 = vpop.f32.mrf.mxu0  ;;  %v1477_v56 = vpop.f32.mrf.mxu1 }
 0x4e4   :  { %v1520_v8 = vadd.f32 %v1457_v11, %v146_v44  ;;  %v1521_v12 = vadd.f32 %v1477_v56, %v187_v22 }
 0x4e6   :  { %v1524_v59 = vmul.f32 0.5, %v1520_v8  ;;  %v1528_v52 = vmul.f32 0.5, %v1521_v12 }
 0x4e8   :  { %1763 = vtanh.f32 %v1524_v59 }
 0x4e9   :  { %1765 = vtanh.f32 %v1528_v52 }
 0x4ea   :  { %v1497_v14 = vpop.f32.mrf.mxu2  ;;  %v1517_v35 = vpop.f32.mrf.mxu3 }
 0x4eb   :  { %v1522_v55 = vadd.f32 %v1497_v14, %v228_v63  ;;  %v1523_v57 = vadd.f32 %v1517_v35, %v269_v38  ;;  %v1591_v60 = vpop.f32.mrf.mxu0 }
 0x4ec   :  { %v1592_v61 = vadd.f32 %v2904_v32, %v1591_v60 }
 0x4ed   :  { %1767 = vtanh.f32 %v1522_v55  ;;  %v1533_v1 = vmul.f32 0.5, %v1523_v57 }
 0x4ee   :  { %v1764_v19 = vpop.eup %1763  ;;  %1769 = vtanh.f32 %v1592_v61 }
 0x4ef   :  { %v1766_v3 = vpop.eup %1765  ;;  %v1526_v5 = vadd.f32 1.0, %v1764_v19  ;;  %1771 = vtanh.f32 %v1533_v1 }
 0x4f0   :  { %v1530_v7 = vadd.f32 1.0, %v1766_v3 }
 0x4f1   :  { %v1527_v29 = vmul.f32 0.5, %v1526_v5 }
 0x4f2   :  { %v1531_v16 = vmul.f32 0.5, %v1530_v7 }
 0x4f3   :  { %v1768_v48 = vpop.eup %1767  ;;  %v1594_v30 = vpop.f32.mrf.mxu0 }
 0x4f4   :  { %v1770_v42 = vpop.eup %1769  ;;  %v1538_v53 = vmul.f32 %v1531_v16, %v1365_v46  ;;  %v1539_v54 = vmul.f32 %v1768_v48, %v1527_v29  ;;  %v1595_v47 = vadd.f32 %v2904_v32, %v1594_v30 }
 0x4f5   :  { %1623 = vst [vmem:[#allocation11] sm:$0xff] %v1770_v42  ;;  %v1772_v2 = vpop.eup %1771 }
 0x4f6   :  { %1773 = vtanh.f32 %v1595_v47  ;;  %v1540_v49 = vadd.f32 %v1539_v54, %v1538_v53  ;;  %v1535_v9 = vadd.f32 1.0, %v1772_v2 }
 0x4f8   :  { %1775 = vtanh.f32 %v1540_v49  ;;  %v1536_v37 = vmul.f32 0.5, %v1535_v9 }
 0x4fb   :  { %v1597_v26 = vpop.f32.mrf.mxu0 }
 0x4fc   :  { %v1774_v62 = vpop.eup %1773  ;;  %v1598_v4 = vadd.f32 %v2904_v32, %v1597_v26 }
 0x4fd   :  { %1624 = vst [vmem:[#allocation11 + $0x8] sm:$0xff] %v1774_v62 }
 0x4fe   :  { %v1776_v20 = vpop.eup %1775  ;;  %1777 = vtanh.f32 %v1598_v4 }
 0x4ff   :  { %v1542_v51 = vmul.f32 %v1776_v20, %v1536_v37 }
 0x501   :  { %1611 = vmatmul.f32.gmra.mxu0 %v1542_v51 }
 0x503   :  { %v1600_v13 = vpop.f32.mrf.mxu0 }
 0x504   :  { %v1778_v15 = vpop.eup %1777  ;;  %v1601_v17 = vadd.f32 %v2904_v32, %v1600_v13 }
 0x505   :  { %1625 = vst [vmem:[#allocation11 + $0x10] sm:$0xff] %v1778_v15 }
 0x506   :  { %1779 = vtanh.f32 %v1601_v17 }
 0x50b   :  { %v1603_v18 = vpop.f32.mrf.mxu0 }
 0x50c   :  { %v1780_v10 = vpop.eup %1779  ;;  %v1604_v58 = vadd.f32 %v2904_v32, %v1603_v18 }
 0x50d   :  { %1626 = vst [vmem:[#allocation11 + $0x18] sm:$0xff] %v1780_v10 }
 0x50e   :  { %1781 = vtanh.f32 %v1604_v58 }
 0x513   :  { %v1606_v27 = vpop.f32.mrf.mxu0 }
 0x514   :  { %v1782_v24 = vpop.eup %1781  ;;  %v1607_v33 = vadd.f32 %v2904_v32, %v1606_v27 }
 0x515   :  { %1627 = vst [vmem:[#allocation11 + $0x20] sm:$0xff] %v1782_v24 }
 0x516   :  { %1783 = vtanh.f32 %v1607_v33 }
 0x51b   :  { %v1609_v0 = vpop.f32.mrf.mxu0 }
 0x51c   :  { %v1784_v28 = vpop.eup %1783  ;;  %v1610_v34 = vadd.f32 %v2904_v32, %v1609_v0 }
 0x51d   :  { %1628 = vst [vmem:[#allocation11 + $0x28] sm:$0xff] %v1784_v28 }
 0x51e   :  { %1785 = vtanh.f32 %v1610_v34 }
 0x524   :  { %v1786_v46 = vpop.eup %1785 }
 0x525   :  { %1629 = vst [vmem:[#allocation11 + $0x30] sm:$0xff] %v1786_v46 }
 0x57e   :  { %v1612_v39 = vpop.f32.mrf.mxu0 }
 0x57f   :  { %v1613_v40 = vadd.f32 %v2904_v32, %v1612_v39 }
 0x581   :  { %1787 = vtanh.f32 %v1613_v40 }
 0x587   :  { %v1788_v43 = vpop.eup %1787 }
 0x588   :  { %1630 = vst [vmem:[#allocation11 + $0x38] sm:$0xff] %v1788_v43 }
 0x589   :  { %1643 = dma.vmem_to_hbm [thread:$0]  %s1636_s18, 1024, %s1638_s21, [#allocation8], %s1871_s9, %s1871_s9, %s1872_s10  }
 0x58a   :  { %1865 = dma.done.wait [#allocation8], 1024  }
 0x58b   :  { %1866 = vsyncadd [#allocation8], 4294966272 }
 0x58c   :  { %1648 = vsyncpa [#allocation7], 1 }
 0x58d   :  { %1649 = vsyncpa [#allocation10], 1 }
 0x58e   :  { %1650 = vsyncpa [#allocation8], 1 }

</bundles_post_ra>
